<compile_context>
chip_gen: v7x
topology: tpu7x:2x2x1
jax: 0.10.0
libtpu: 0.0.40
codegen_flags: <defaults>
</compile_context>

<pallas_src>
import jax
import jax.numpy as jnp
import numpy as np
from jax import lax
from jax.experimental import pallas as pl
from jax.experimental.pallas import tpu as pltpu

_LANE = 128


def _make_kernel(meta, csum):
    """meta: per-level tuples (c, hw, off, mode, rows, g); mode is 'col' or 'lane'."""
    n_lvl = len(meta)
    n_w = sum(1 if m[3] == "col" else m[5] for m in meta)

    def kernel(*refs):
        conv_ref = refs[0]                                   # (3,) f32 taps in SMEM
        t_refs = refs[1:1 + n_lvl]                           # (1, c_i, hw_i) feature tiles
        w_refs = refs[1 + n_lvl:1 + n_lvl + n_w]             # FC weight blocks (bf16)
        b_refs = refs[1 + n_lvl + n_w:1 + n_lvl + 2 * n_w]   # FC bias blocks (f32 columns)
        o_refs = refs[1 + n_lvl + 2 * n_w:1 + n_lvl + 2 * n_w + n_lvl]
        q_ref = refs[-1]                                     # (Csum+2, 1) f32 scratch

        # ---- 1) Global average pool per level, as an MXU ones-matvec (f32 accumulate,
        #         no full-tile f32 cast).  Results land in a zero-padded column so the
        #         conv below reads its 3 taps as plain shifted slices with correct
        #         zero boundaries.
        q_ref[...] = jnp.zeros_like(q_ref)
        for t_ref, (c, hw, off, _mode, _rows, _g) in zip(t_refs, meta):
            x = t_ref[0]                                               # (c, hw) input dtype
            ones = jnp.ones((hw, 1), x.dtype)
            s = jnp.dot(x, ones, preferred_element_type=jnp.float32)   # (c, 1) f32
            q_ref[pl.ds(1 + off, c), :] = s * (1.0 / hw)

        # ---- 2) Conv1d(1->1, k=3, pad=1, bias=False) over the concatenated channels:
        #         y[c] = w0*q[c-1] + w1*q[c] + w2*q[c+1]  (shifted reads of the padded
        #         column; no dense banded matrix).
        w0 = conv_ref[0]
        w1 = conv_ref[1]
        w2 = conv_ref[2]
        y = (w0 * q_ref[pl.ds(0, csum), :] +
             w1 * q_ref[pl.ds(1, csum), :] +
             w2 * q_ref[pl.ds(2, csum), :])                            # (Csum, 1) f32
        y = y.astype(w_refs[0].dtype)                                  # bf16 for the FC dots

        # ---- 3) Shared FC + sigmoid (cast the tiny column) + broadcast store per level.
        wi = 0
        for (c, hw, off, mode, rows, g), o_ref in zip(meta, o_refs):
            if mode == "col":
                # Output layout (1, c, hw): lane-dense whenever hw % 128 == 0.
                z = (jnp.dot(w_refs[wi][...], y, preferred_element_type=jnp.float32)
                     + b_refs[wi][...])                                # (c, 1) f32
                wi += 1
                att = jax.nn.sigmoid(z).astype(o_ref.dtype)            # cast before broadcast
                o_ref[0] = jnp.broadcast_to(att, (c, hw))
            else:
                # Packed lane-dense layout (1, rows, 128): each 128-lane row holds
                # g = 128 // hw consecutive channels, each repeated hw times.  Channel
                # off + r*g + j comes from the j-th pre-strided FC slice, so the slab is
                # built with lane-broadcasts + iota selects (no gather / minor reshape).
                lane = lax.broadcasted_iota(jnp.int32, (rows, _LANE), 1)
                out = None
                for j in range(g):
                    z = (jnp.dot(w_refs[wi][...], y, preferred_element_type=jnp.float32)
                         + b_refs[wi][...])                            # (rows, 1) f32
                    wi += 1
                    att_j = jax.nn.sigmoid(z).astype(o_ref.dtype)
                    att_b = jnp.broadcast_to(att_j, (rows, _LANE))
                    out = att_b if j == 0 else jnp.where(lane >= j * hw, att_b, out)
                o_ref[0] = out

    return kernel


def _pad_bytes(shape, dtype):
    """Approximate VMEM footprint of a 2-D tile (last dim -> 128, 2nd-last -> 8)."""
    s = [int(d) for d in shape]
    s[-1] = -(-s[-1] // 128) * 128
    if len(s) >= 2:
        s[-2] = -(-s[-2] // 8) * 8
    n = 1
    for d in s:
        n *= d
    return n * jnp.dtype(dtype).itemsize


def lightweight_channel_att_bridge(ts, conv_w, fc_w, fc_b, *, weight_dtype=jnp.bfloat16):
    """ts = (t1..t5) NCHW; conv_w (1,1,3); fc_w (Csum,Csum); fc_b (Csum,)."""
    ts = tuple(ts)
    assert len(ts) == 5
    N = int(ts[0].shape[0])
    c_list = [int(t.shape[1]) for t in ts]
    hw_list = [int(t.shape[2]) * int(t.shape[3]) for t in ts]
    csum = sum(c_list)
    offs = [0]
    for c in c_list[:-1]:
        offs.append(offs[-1] + c)

    # Per-level output layout decision:
    #   "col"  -> (N, c, hw)            (lane-dense when hw is a multiple of 128)
    #   "lane" -> (N, c*hw//128, 128)   packed so every store is a full-lane vst
    meta = []
    for c, hw, off in zip(c_list, hw_list, offs):
        if hw < _LANE and _LANE % hw == 0 and (c * hw) % _LANE == 0:
            meta.append((c, hw, off, "lane", (c * hw) // _LANE, _LANE // hw))
        else:
            # TODO(synk): hw >= 128 but not a multiple of 128 still gives masked stores.
            meta.append((c, hw, off, "col", 0, 0))
    meta = tuple(meta)

    # NCHW -> (N, C, H*W): free contiguous reshape (no HBM transpose / pad / cast).
    xs = [t.reshape(N, c, hw) for t, c, hw in zip(ts, c_list, hw_list)]

    # Conv taps as three SMEM scalars.
    conv_taps = conv_w.reshape(3).astype(jnp.float32)

    # Shared-FC blocks: bf16 weights (f32 accumulation in-kernel), f32 biases.
    # For "lane" levels the rows are pre-strided so channel (off + r*g + j) is row r
    # of slice j — exactly what the packed broadcast in the kernel needs.
    fc_w_c = fc_w.astype(weight_dtype)
    fc_b_c = fc_b.astype(jnp.float32)
    w_blocks, b_blocks = [], []
    for c, hw, off, mode, rows, g in meta:
        if mode == "col":
            w_blocks.append(fc_w_c[off:off + c, :])
            b_blocks.append(fc_b_c[off:off + c].reshape(c, 1))
        else:
            for j in range(g):
                w_blocks.append(fc_w_c[off + j:off + c:g, :])
                b_blocks.append(fc_b_c[off + j:off + c:g].reshape(rows, 1))

    in_specs = (
        [pl.BlockSpec(memory_space=pltpu.MemorySpace.SMEM)]
        + [pl.BlockSpec((1, c, hw), lambda n: (n, 0, 0))
           for c, hw in zip(c_list, hw_list)]
        + [pl.BlockSpec(tuple(w.shape), lambda n: (0, 0)) for w in w_blocks]
        + [pl.BlockSpec(tuple(b.shape), lambda n: (0, 0)) for b in b_blocks]
    )

    out_specs, out_shape = [], []
    for t, (c, hw, off, mode, rows, g) in zip(ts, meta):
        if mode == "col":
            out_specs.append(pl.BlockSpec((1, c, hw), lambda n: (n, 0, 0)))
            out_shape.append(jax.ShapeDtypeStruct((N, c, hw), t.dtype))
        else:
            out_specs.append(pl.BlockSpec((1, rows, _LANE), lambda n: (n, 0, 0)))
            out_shape.append(jax.ShapeDtypeStruct((N, rows, _LANE), t.dtype))

    # Explicit VMEM budget: double-buffered feature tiles + (double-buffered) weights
    # + scratch, with headroom; capped at 3/4 of physical VMEM.
    tile_bytes = 0
    for x, t, (c, hw, off, mode, rows, g) in zip(xs, ts, meta):
        in_b = _pad_bytes((c, hw), x.dtype)
        out_b = _pad_bytes((c, hw) if mode == "col" else (rows, _LANE), t.dtype)
        tile_bytes += 2 * (in_b + out_b)
    weight_bytes = 2 * (sum(_pad_bytes(w.shape, w.dtype) for w in w_blocks)
                        + sum(_pad_bytes(b.shape, b.dtype) for b in b_blocks))
    need = tile_bytes + weight_bytes + _pad_bytes((csum + 2, 1), jnp.float32)
    try:
        vmem_cap = int(pltpu.get_tpu_info().vmem_capacity_bytes)
    except Exception:  # pragma: no cover - conservative fallback
        vmem_cap = 64 << 20
    vmem_limit = max(32 << 20, min(int(need * 1.25) + (4 << 20), vmem_cap * 3 // 4))

    outs = pl.pallas_call(
        _make_kernel(meta, csum),
        out_shape=tuple(out_shape),
        grid_spec=pltpu.PrefetchScalarGridSpec(
            num_scalar_prefetch=0,
            grid=(N,),
            in_specs=in_specs,
            out_specs=tuple(out_specs),
            scratch_shapes=[pltpu.VMEM((csum + 2, 1), jnp.float32)],
        ),
        compiler_params=pltpu.CompilerParams(
            dimension_semantics=("parallel",),
            vmem_limit_bytes=vmem_limit,
        ),
    )(conv_taps, *xs, *w_blocks, *b_blocks)

    # Packed / flattened layouts reshape back to NCHW for free (flat order is
    # channel-major, identical to the PyTorch expand_as output).
    return tuple(o.reshape(t.shape) for o, t in zip(outs, ts))


def _reference(ts, conv_w, fc_w, fc_b):
    """Pure-JAX f32 reference of the PyTorch forward (NCHW)."""
    pooled = jnp.concatenate([jnp.mean(t, axis=(2, 3)) for t in ts], axis=1)   # (N, Csum)
    w3 = conv_w.reshape(3)
    p = jnp.pad(pooled, ((0, 0), (1, 1)))
    att = w3[0] * p[:, :-2] + w3[1] * p[:, 1:-1] + w3[2] * p[:, 2:]            # conv1d k=3
    att = jnp.dot(att, fc_w.T, precision=lax.Precision.HIGHEST) + fc_b         # shared FC
    att = jax.nn.sigmoid(att)
    outs, s = [], 0
    for t in ts:
        c = t.shape[1]
        outs.append(jnp.broadcast_to(att[:, s:s + c][:, :, None, None], t.shape))
        s += c
    return tuple(outs)


if __name__ == "__main__":
    N = 2
    c_list = (4, 8, 16, 32, 64)
    spatial = (16, 16, 8, 8, 4)
    csum = sum(c_list)

    key = jax.random.PRNGKey(0)
    keys = jax.random.split(key, len(c_list) + 3)

    ts = [jax.random.normal(keys[i], (N, c, s, s), jnp.float32)
          for i, (c, s) in enumerate(zip(c_list, spatial))]
    conv_w = 0.5 * jax.random.normal(keys[5], (1, 1, 3), jnp.float32)       # Conv1d weight
    fc_w = jax.random.normal(keys[6], (csum, csum), jnp.float32) / np.sqrt(csum)
    fc_b = 0.1 * jax.random.normal(keys[7], (csum,), jnp.float32)

    outs = lightweight_channel_att_bridge(ts, conv_w, fc_w, fc_b)
    outs = jax.block_until_ready(outs)

    refs_out = _reference(ts, conv_w, fc_w, fc_b)
    refs_out = jax.block_until_ready(refs_out)

    # Kernel uses bf16 FC weights with f32 accumulation; expected deviation from the
    # f32 reference is ~1e-3 on sigmoid outputs, well inside 5e-3.
    for o, r, t in zip(outs, refs_out, ts):
        assert o.shape == t.shape
        np.testing.assert_allclose(np.asarray(o), np.asarray(r), rtol=5e-3, atol=5e-3)
    print("KERNEL_OK")
</pallas_src>

<mosaic_0001>
module attributes {stable_mosaic.version = 11 : i64} {
  func.func @kernel(%arg0: i32, %arg1: memref<3xf32, #tpu.memory_space<smem>>, %arg2: memref<1x4x256xf32, #tpu.memory_space<vmem>>, %arg3: memref<1x8x256xf32, #tpu.memory_space<vmem>>, %arg4: memref<1x16x64xf32, #tpu.memory_space<vmem>>, %arg5: memref<1x32x64xf32, #tpu.memory_space<vmem>>, %arg6: memref<1x64x16xf32, #tpu.memory_space<vmem>>, %arg7: memref<4x124xbf16, #tpu.memory_space<vmem>>, %arg8: memref<8x124xbf16, #tpu.memory_space<vmem>>, %arg9: memref<8x124xbf16, #tpu.memory_space<vmem>>, %arg10: memref<8x124xbf16, #tpu.memory_space<vmem>>, %arg11: memref<16x124xbf16, #tpu.memory_space<vmem>>, %arg12: memref<16x124xbf16, #tpu.memory_space<vmem>>, %arg13: memref<8x124xbf16, #tpu.memory_space<vmem>>, %arg14: memref<8x124xbf16, #tpu.memory_space<vmem>>, %arg15: memref<8x124xbf16, #tpu.memory_space<vmem>>, %arg16: memref<8x124xbf16, #tpu.memory_space<vmem>>, %arg17: memref<8x124xbf16, #tpu.memory_space<vmem>>, %arg18: memref<8x124xbf16, #tpu.memory_space<vmem>>, %arg19: memref<8x124xbf16, #tpu.memory_space<vmem>>, %arg20: memref<8x124xbf16, #tpu.memory_space<vmem>>, %arg21: memref<4x1xf32, #tpu.memory_space<vmem>>, %arg22: memref<8x1xf32, #tpu.memory_space<vmem>>, %arg23: memref<8x1xf32, #tpu.memory_space<vmem>>, %arg24: memref<8x1xf32, #tpu.memory_space<vmem>>, %arg25: memref<16x1xf32, #tpu.memory_space<vmem>>, %arg26: memref<16x1xf32, #tpu.memory_space<vmem>>, %arg27: memref<8x1xf32, #tpu.memory_space<vmem>>, %arg28: memref<8x1xf32, #tpu.memory_space<vmem>>, %arg29: memref<8x1xf32, #tpu.memory_space<vmem>>, %arg30: memref<8x1xf32, #tpu.memory_space<vmem>>, %arg31: memref<8x1xf32, #tpu.memory_space<vmem>>, %arg32: memref<8x1xf32, #tpu.memory_space<vmem>>, %arg33: memref<8x1xf32, #tpu.memory_space<vmem>>, %arg34: memref<8x1xf32, #tpu.memory_space<vmem>>, %arg35: memref<1x4x256xf32, #tpu.memory_space<vmem>>, %arg36: memref<1x8x256xf32, #tpu.memory_space<vmem>>, %arg37: memref<1x8x128xf32, #tpu.memory_space<vmem>>, %arg38: memref<1x16x128xf32, #tpu.memory_space<vmem>>, %arg39: memref<1x8x128xf32, #tpu.memory_space<vmem>>, %arg40: memref<126x1xf32, #tpu.memory_space<vmem>>) attributes {dimension_semantics = [#tpu.dimension_semantics<parallel>], iteration_bounds = array<i64: 2>, scalar_prefetch = 0 : i64, scratch_operands = 1 : i64, tpu.core_type = #tpu.core_type<tc>, window_params = [{transform_indices = @transform_0, window_bounds = array<i64: 3>}, {transform_indices = @transform_1, window_bounds = array<i64: 1, 4, 256>}, {transform_indices = @transform_2, window_bounds = array<i64: 1, 8, 256>}, {transform_indices = @transform_3, window_bounds = array<i64: 1, 16, 64>}, {transform_indices = @transform_4, window_bounds = array<i64: 1, 32, 64>}, {transform_indices = @transform_5, window_bounds = array<i64: 1, 64, 16>}, {pipeline_mode = #tpu.pipeline_mode<synchronous>, transform_indices = @transform_6, window_bounds = array<i64: 4, 124>}, {pipeline_mode = #tpu.pipeline_mode<synchronous>, transform_indices = @transform_7, window_bounds = array<i64: 8, 124>}, {pipeline_mode = #tpu.pipeline_mode<synchronous>, transform_indices = @transform_8, window_bounds = array<i64: 8, 124>}, {pipeline_mode = #tpu.pipeline_mode<synchronous>, transform_indices = @transform_9, window_bounds = array<i64: 8, 124>}, {pipeline_mode = #tpu.pipeline_mode<synchronous>, transform_indices = @transform_10, window_bounds = array<i64: 16, 124>}, {pipeline_mode = #tpu.pipeline_mode<synchronous>, transform_indices = @transform_11, window_bounds = array<i64: 16, 124>}, {pipeline_mode = #tpu.pipeline_mode<synchronous>, transform_indices = @transform_12, window_bounds = array<i64: 8, 124>}, {pipeline_mode = #tpu.pipeline_mode<synchronous>, transform_indices = @transform_13, window_bounds = array<i64: 8, 124>}, {pipeline_mode = #tpu.pipeline_mode<synchronous>, transform_indices = @transform_14, window_bounds = array<i64: 8, 124>}, {pipeline_mode = #tpu.pipeline_mode<synchronous>, transform_indices = @transform_15, window_bounds = array<i64: 8, 124>}, {pipeline_mode = #tpu.pipeline_mode<synchronous>, transform_indices = @transform_16, window_bounds = array<i64: 8, 124>}, {pipeline_mode = #tpu.pipeline_mode<synchronous>, transform_indices = @transform_17, window_bounds = array<i64: 8, 124>}, {pipeline_mode = #tpu.pipeline_mode<synchronous>, transform_indices = @transform_18, window_bounds = array<i64: 8, 124>}, {pipeline_mode = #tpu.pipeline_mode<synchronous>, transform_indices = @transform_19, window_bounds = array<i64: 8, 124>}, {pipeline_mode = #tpu.pipeline_mode<synchronous>, transform_indices = @transform_20, window_bounds = array<i64: 4, 1>}, {pipeline_mode = #tpu.pipeline_mode<synchronous>, transform_indices = @transform_21, window_bounds = array<i64: 8, 1>}, {pipeline_mode = #tpu.pipeline_mode<synchronous>, transform_indices = @transform_22, window_bounds = array<i64: 8, 1>}, {pipeline_mode = #tpu.pipeline_mode<synchronous>, transform_indices = @transform_23, window_bounds = array<i64: 8, 1>}, {pipeline_mode = #tpu.pipeline_mode<synchronous>, transform_indices = @transform_24, window_bounds = array<i64: 16, 1>}, {pipeline_mode = #tpu.pipeline_mode<synchronous>, transform_indices = @transform_25, window_bounds = array<i64: 16, 1>}, {pipeline_mode = #tpu.pipeline_mode<synchronous>, transform_indices = @transform_26, window_bounds = array<i64: 8, 1>}, {pipeline_mode = #tpu.pipeline_mode<synchronous>, transform_indices = @transform_27, window_bounds = array<i64: 8, 1>}, {pipeline_mode = #tpu.pipeline_mode<synchronous>, transform_indices = @transform_28, window_bounds = array<i64: 8, 1>}, {pipeline_mode = #tpu.pipeline_mode<synchronous>, transform_indices = @transform_29, window_bounds = array<i64: 8, 1>}, {pipeline_mode = #tpu.pipeline_mode<synchronous>, transform_indices = @transform_30, window_bounds = array<i64: 8, 1>}, {pipeline_mode = #tpu.pipeline_mode<synchronous>, transform_indices = @transform_31, window_bounds = array<i64: 8, 1>}, {pipeline_mode = #tpu.pipeline_mode<synchronous>, transform_indices = @transform_32, window_bounds = array<i64: 8, 1>}, {pipeline_mode = #tpu.pipeline_mode<synchronous>, transform_indices = @transform_33, window_bounds = array<i64: 8, 1>}, {transform_indices = @transform_34, window_bounds = array<i64: 1, 4, 256>}, {transform_indices = @transform_35, window_bounds = array<i64: 1, 8, 256>}, {transform_indices = @transform_36, window_bounds = array<i64: 1, 8, 128>}, {transform_indices = @transform_37, window_bounds = array<i64: 1, 16, 128>}, {transform_indices = @transform_38, window_bounds = array<i64: 1, 8, 128>}]} {
    %cst = arith.constant 0.000000e+00 : f32
    %0 = vector.broadcast %cst : f32 to vector<126x1xf32>
    %c0 = arith.constant 0 : index
    %c0_0 = arith.constant 0 : index
    %1 = vector.load %arg40[%c0, %c0_0] : memref<126x1xf32, #tpu.memory_space<vmem>>, vector<126x1xf32>
    tpu.vector_store %arg40[%c0, %c0_0], %0 {strides = array<i32>} : memref<126x1xf32, #tpu.memory_space<vmem>>, vector<126x1xf32>,
    %c0_1 = arith.constant 0 : index
    %c0_2 = arith.constant 0 : index
    %c0_3 = arith.constant 0 : index
    %2 = vector.load %arg2[%c0_1, %c0_2, %c0_3] : memref<1x4x256xf32, #tpu.memory_space<vmem>>, vector<1x4x256xf32>
    %3 = vector.shape_cast %2 : vector<1x4x256xf32> to vector<4x256xf32>
    %cst_4 = arith.constant 1.000000e+00 : f32
    %4 = vector.broadcast %cst_4 : f32 to vector<256x1xf32>
    %cst_5 = arith.constant dense<0.000000e+00> : vector<4x1xf32>
    %5 = tpu.matmul %3, %4, %cst_5 {dimension_numbers = #tpu.dot_dimension_numbers<[1], [0], [0], [1], [0, 0, 1, 1], [], []>} : vector<4x256xf32>, vector<256x1xf32>, vector<4x1xf32> -> vector<4x1xf32>
    %cst_6 = arith.constant 3.906250e-03 : f32
    %6 = vector.broadcast %cst_6 : f32 to vector<4x1xf32>
    %7 = arith.mulf %5, %6 : vector<4x1xf32>
    %c1 = arith.constant 1 : index
    %c0_7 = arith.constant 0 : index
    %8 = vector.load %arg40[%c1, %c0_7] : memref<126x1xf32, #tpu.memory_space<vmem>>, vector<4x1xf32>
    tpu.vector_store %arg40[%c1, %c0_7], %7 {strides = array<i32>} : memref<126x1xf32, #tpu.memory_space<vmem>>, vector<4x1xf32>,
    %c0_8 = arith.constant 0 : index
    %c0_9 = arith.constant 0 : index
    %c0_10 = arith.constant 0 : index
    %9 = vector.load %arg3[%c0_8, %c0_9, %c0_10] : memref<1x8x256xf32, #tpu.memory_space<vmem>>, vector<1x8x256xf32>
    %10 = vector.shape_cast %9 : vector<1x8x256xf32> to vector<8x256xf32>
    %cst_11 = arith.constant 1.000000e+00 : f32
    %11 = vector.broadcast %cst_11 : f32 to vector<256x1xf32>
    %cst_12 = arith.constant dense<0.000000e+00> : vector<8x1xf32>
    %12 = tpu.matmul %10, %11, %cst_12 {dimension_numbers = #tpu.dot_dimension_numbers<[1], [0], [0], [1], [0, 0, 1, 1], [], []>} : vector<8x256xf32>, vector<256x1xf32>, vector<8x1xf32> -> vector<8x1xf32>
    %cst_13 = arith.constant 3.906250e-03 : f32
    %13 = vector.broadcast %cst_13 : f32 to vector<8x1xf32>
    %14 = arith.mulf %12, %13 : vector<8x1xf32>
    %c5 = arith.constant 5 : index
    %c0_14 = arith.constant 0 : index
    %15 = vector.load %arg40[%c5, %c0_14] : memref<126x1xf32, #tpu.memory_space<vmem>>, vector<8x1xf32>
    tpu.vector_store %arg40[%c5, %c0_14], %14 {strides = array<i32>} : memref<126x1xf32, #tpu.memory_space<vmem>>, vector<8x1xf32>,
    %c0_15 = arith.constant 0 : index
    %c0_16 = arith.constant 0 : index
    %c0_17 = arith.constant 0 : index
    %16 = vector.load %arg4[%c0_15, %c0_16, %c0_17] : memref<1x16x64xf32, #tpu.memory_space<vmem>>, vector<1x16x64xf32>
    %17 = vector.shape_cast %16 : vector<1x16x64xf32> to vector<16x64xf32>
    %cst_18 = arith.constant 1.000000e+00 : f32
    %18 = vector.broadcast %cst_18 : f32 to vector<64x1xf32>
    %cst_19 = arith.constant dense<0.000000e+00> : vector<16x1xf32>
    %19 = tpu.matmul %17, %18, %cst_19 {dimension_numbers = #tpu.dot_dimension_numbers<[1], [0], [0], [1], [0, 0, 1, 1], [], []>} : vector<16x64xf32>, vector<64x1xf32>, vector<16x1xf32> -> vector<16x1xf32>
    %cst_20 = arith.constant 1.562500e-02 : f32
    %20 = vector.broadcast %cst_20 : f32 to vector<16x1xf32>
    %21 = arith.mulf %19, %20 : vector<16x1xf32>
    %c13 = arith.constant 13 : index
    %c0_21 = arith.constant 0 : index
    %22 = vector.load %arg40[%c13, %c0_21] : memref<126x1xf32, #tpu.memory_space<vmem>>, vector<16x1xf32>
    tpu.vector_store %arg40[%c13, %c0_21], %21 {strides = array<i32>} : memref<126x1xf32, #tpu.memory_space<vmem>>, vector<16x1xf32>,
    %c0_22 = arith.constant 0 : index
    %c0_23 = arith.constant 0 : index
    %c0_24 = arith.constant 0 : index
    %23 = vector.load %arg5[%c0_22, %c0_23, %c0_24] : memref<1x32x64xf32, #tpu.memory_space<vmem>>, vector<1x32x64xf32>
    %24 = vector.shape_cast %23 : vector<1x32x64xf32> to vector<32x64xf32>
    %cst_25 = arith.constant 1.000000e+00 : f32
    %25 = vector.broadcast %cst_25 : f32 to vector<64x1xf32>
    %cst_26 = arith.constant dense<0.000000e+00> : vector<32x1xf32>
    %26 = tpu.matmul %24, %25, %cst_26 {dimension_numbers = #tpu.dot_dimension_numbers<[1], [0], [0], [1], [0, 0, 1, 1], [], []>} : vector<32x64xf32>, vector<64x1xf32>, vector<32x1xf32> -> vector<32x1xf32>
    %cst_27 = arith.constant 1.562500e-02 : f32
    %27 = vector.broadcast %cst_27 : f32 to vector<32x1xf32>
    %28 = arith.mulf %26, %27 : vector<32x1xf32>
    %c29 = arith.constant 29 : index
    %c0_28 = arith.constant 0 : index
    %29 = vector.load %arg40[%c29, %c0_28] : memref<126x1xf32, #tpu.memory_space<vmem>>, vector<32x1xf32>
    tpu.vector_store %arg40[%c29, %c0_28], %28 {strides = array<i32>} : memref<126x1xf32, #tpu.memory_space<vmem>>, vector<32x1xf32>,
    %c0_29 = arith.constant 0 : index
    %c0_30 = arith.constant 0 : index
    %c0_31 = arith.constant 0 : index
    %30 = vector.load %arg6[%c0_29, %c0_30, %c0_31] : memref<1x64x16xf32, #tpu.memory_space<vmem>>, vector<1x64x16xf32>
    %31 = vector.shape_cast %30 : vector<1x64x16xf32> to vector<64x16xf32>
    %cst_32 = arith.constant 1.000000e+00 : f32
    %32 = vector.broadcast %cst_32 : f32 to vector<16x1xf32>
    %cst_33 = arith.constant dense<0.000000e+00> : vector<64x1xf32>
    %33 = tpu.matmul %31, %32, %cst_33 {dimension_numbers = #tpu.dot_dimension_numbers<[1], [0], [0], [1], [0, 0, 1, 1], [], []>} : vector<64x16xf32>, vector<16x1xf32>, vector<64x1xf32> -> vector<64x1xf32>
    %cst_34 = arith.constant 6.250000e-02 : f32
    %34 = vector.broadcast %cst_34 : f32 to vector<64x1xf32>
    %35 = arith.mulf %33, %34 : vector<64x1xf32>
    %c61 = arith.constant 61 : index
    %c0_35 = arith.constant 0 : index
    %36 = vector.load %arg40[%c61, %c0_35] : memref<126x1xf32, #tpu.memory_space<vmem>>, vector<64x1xf32>
    tpu.vector_store %arg40[%c61, %c0_35], %35 {strides = array<i32>} : memref<126x1xf32, #tpu.memory_space<vmem>>, vector<64x1xf32>,
    %c0_36 = arith.constant 0 : index
    %37 = memref.load %arg1[%c0_36] : memref<3xf32, #tpu.memory_space<smem>>
    %c1_37 = arith.constant 1 : index
    %38 = memref.load %arg1[%c1_37] : memref<3xf32, #tpu.memory_space<smem>>
    %c2 = arith.constant 2 : index
    %39 = memref.load %arg1[%c2] : memref<3xf32, #tpu.memory_space<smem>>
    %c0_38 = arith.constant 0 : index
    %c0_39 = arith.constant 0 : index
    %40 = vector.load %arg40[%c0_38, %c0_39] : memref<126x1xf32, #tpu.memory_space<vmem>>, vector<124x1xf32>
    %41 = vector.broadcast %37 : f32 to vector<124x1xf32>
    %42 = arith.mulf %41, %40 : vector<124x1xf32>
    %c1_40 = arith.constant 1 : index
    %c0_41 = arith.constant 0 : index
    %43 = vector.load %arg40[%c1_40, %c0_41] : memref<126x1xf32, #tpu.memory_space<vmem>>, vector<124x1xf32>
    %44 = vector.broadcast %38 : f32 to vector<124x1xf32>
    %45 = arith.mulf %44, %43 : vector<124x1xf32>
    %46 = arith.addf %42, %45 : vector<124x1xf32>
    %c2_42 = arith.constant 2 : index
    %c0_43 = arith.constant 0 : index
    %47 = vector.load %arg40[%c2_42, %c0_43] : memref<126x1xf32, #tpu.memory_space<vmem>>, vector<124x1xf32>
    %48 = vector.broadcast %39 : f32 to vector<124x1xf32>
    %49 = arith.mulf %48, %47 : vector<124x1xf32>
    %50 = arith.addf %46, %49 : vector<124x1xf32>
    %51 = arith.truncf %50 : vector<124x1xf32> to vector<124x1xbf16>
    %c0_44 = arith.constant 0 : index
    %c0_45 = arith.constant 0 : index
    %52 = vector.load %arg7[%c0_44, %c0_45] : memref<4x124xbf16, #tpu.memory_space<vmem>>, vector<4x124xbf16>
    %cst_46 = arith.constant dense<0.000000e+00> : vector<4x1xf32>
    %53 = tpu.matmul %52, %51, %cst_46 {dimension_numbers = #tpu.dot_dimension_numbers<[1], [0], [0], [1], [0, 0, 1, 1], [], []>} : vector<4x124xbf16>, vector<124x1xbf16>, vector<4x1xf32> -> vector<4x1xf32>
    %c0_47 = arith.constant 0 : index
    %c0_48 = arith.constant 0 : index
    %54 = vector.load %arg21[%c0_47, %c0_48] : memref<4x1xf32, #tpu.memory_space<vmem>>, vector<4x1xf32>
    %55 = arith.addf %53, %54 : vector<4x1xf32>
    %56 = arith.negf %55 : vector<4x1xf32>
    %57 = math.exp %56 : vector<4x1xf32>
    %cst_49 = arith.constant 1.000000e+00 : f32
    %58 = vector.broadcast %cst_49 : f32 to vector<4x1xf32>
    %59 = arith.addf %58, %57 : vector<4x1xf32>
    %60 = arith.divf %58, %59 : vector<4x1xf32>
    %61 = vector.shape_cast %60 : vector<4x1xf32> to vector<4x1xf32>
    %62 = vector.broadcast %61 : vector<4x1xf32> to vector<4x256xf32>
    %c0_50 = arith.constant 0 : index
    %c0_51 = arith.constant 0 : index
    %c0_52 = arith.constant 0 : index
    %63 = vector.load %arg35[%c0_50, %c0_51, %c0_52] : memref<1x4x256xf32, #tpu.memory_space<vmem>>, vector<1x4x256xf32>
    %64 = vector.shape_cast %63 : vector<1x4x256xf32> to vector<4x256xf32>
    %65 = vector.shape_cast %62 : vector<4x256xf32> to vector<1x4x256xf32>
    tpu.vector_store %arg35[%c0_50, %c0_51, %c0_52], %65 {strides = array<i32>} : memref<1x4x256xf32, #tpu.memory_space<vmem>>, vector<1x4x256xf32>,
    %c0_53 = arith.constant 0 : index
    %c0_54 = arith.constant 0 : index
    %66 = vector.load %arg8[%c0_53, %c0_54] : memref<8x124xbf16, #tpu.memory_space<vmem>>, vector<8x124xbf16>
    %cst_55 = arith.constant dense<0.000000e+00> : vector<8x1xf32>
    %67 = tpu.matmul %66, %51, %cst_55 {dimension_numbers = #tpu.dot_dimension_numbers<[1], [0], [0], [1], [0, 0, 1, 1], [], []>} : vector<8x124xbf16>, vector<124x1xbf16>, vector<8x1xf32> -> vector<8x1xf32>
    %c0_56 = arith.constant 0 : index
    %c0_57 = arith.constant 0 : index
    %68 = vector.load %arg22[%c0_56, %c0_57] : memref<8x1xf32, #tpu.memory_space<vmem>>, vector<8x1xf32>
    %69 = arith.addf %67, %68 : vector<8x1xf32>
    %70 = arith.negf %69 : vector<8x1xf32>
    %71 = math.exp %70 : vector<8x1xf32>
    %cst_58 = arith.constant 1.000000e+00 : f32
    %72 = vector.broadcast %cst_58 : f32 to vector<8x1xf32>
    %73 = arith.addf %72, %71 : vector<8x1xf32>
    %74 = arith.divf %72, %73 : vector<8x1xf32>
    %75 = vector.shape_cast %74 : vector<8x1xf32> to vector<8x1xf32>
    %76 = vector.broadcast %75 : vector<8x1xf32> to vector<8x256xf32>
    %c0_59 = arith.constant 0 : index
    %c0_60 = arith.constant 0 : index
    %c0_61 = arith.constant 0 : index
    %77 = vector.load %arg36[%c0_59, %c0_60, %c0_61] : memref<1x8x256xf32, #tpu.memory_space<vmem>>, vector<1x8x256xf32>
    %78 = vector.shape_cast %77 : vector<1x8x256xf32> to vector<8x256xf32>
    %79 = vector.shape_cast %76 : vector<8x256xf32> to vector<1x8x256xf32>
    tpu.vector_store %arg36[%c0_59, %c0_60, %c0_61], %79 {strides = array<i32>} : memref<1x8x256xf32, #tpu.memory_space<vmem>>, vector<1x8x256xf32>,
    %80 = tpu.iota {dimensions = array<i32: 1>} : vector<8x128xi32>
    %c0_62 = arith.constant 0 : index
    %c0_63 = arith.constant 0 : index
    %81 = vector.load %arg9[%c0_62, %c0_63] : memref<8x124xbf16, #tpu.memory_space<vmem>>, vector<8x124xbf16>
    %cst_64 = arith.constant dense<0.000000e+00> : vector<8x1xf32>
    %82 = tpu.matmul %81, %51, %cst_64 {dimension_numbers = #tpu.dot_dimension_numbers<[1], [0], [0], [1], [0, 0, 1, 1], [], []>} : vector<8x124xbf16>, vector<124x1xbf16>, vector<8x1xf32> -> vector<8x1xf32>
    %c0_65 = arith.constant 0 : index
    %c0_66 = arith.constant 0 : index
    %83 = vector.load %arg23[%c0_65, %c0_66] : memref<8x1xf32, #tpu.memory_space<vmem>>, vector<8x1xf32>
    %84 = arith.addf %82, %83 : vector<8x1xf32>
    %85 = arith.negf %84 : vector<8x1xf32>
    %86 = math.exp %85 : vector<8x1xf32>
    %cst_67 = arith.constant 1.000000e+00 : f32
    %87 = vector.broadcast %cst_67 : f32 to vector<8x1xf32>
    %88 = arith.addf %87, %86 : vector<8x1xf32>
    %89 = arith.divf %87, %88 : vector<8x1xf32>
    %90 = vector.shape_cast %89 : vector<8x1xf32> to vector<8x1xf32>
    %91 = vector.broadcast %90 : vector<8x1xf32> to vector<8x128xf32>
    %c0_68 = arith.constant 0 : index
    %c0_69 = arith.constant 0 : index
    %92 = vector.load %arg10[%c0_68, %c0_69] : memref<8x124xbf16, #tpu.memory_space<vmem>>, vector<8x124xbf16>
    %cst_70 = arith.constant dense<0.000000e+00> : vector<8x1xf32>
    %93 = tpu.matmul %92, %51, %cst_70 {dimension_numbers = #tpu.dot_dimension_numbers<[1], [0], [0], [1], [0, 0, 1, 1], [], []>} : vector<8x124xbf16>, vector<124x1xbf16>, vector<8x1xf32> -> vector<8x1xf32>
    %c0_71 = arith.constant 0 : index
    %c0_72 = arith.constant 0 : index
    %94 = vector.load %arg24[%c0_71, %c0_72] : memref<8x1xf32, #tpu.memory_space<vmem>>, vector<8x1xf32>
    %95 = arith.addf %93, %94 : vector<8x1xf32>
    %96 = arith.negf %95 : vector<8x1xf32>
    %97 = math.exp %96 : vector<8x1xf32>
    %cst_73 = arith.constant 1.000000e+00 : f32
    %98 = vector.broadcast %cst_73 : f32 to vector<8x1xf32>
    %99 = arith.addf %98, %97 : vector<8x1xf32>
    %100 = arith.divf %98, %99 : vector<8x1xf32>
    %101 = vector.shape_cast %100 : vector<8x1xf32> to vector<8x1xf32>
    %102 = vector.broadcast %101 : vector<8x1xf32> to vector<8x128xf32>
    %c64_i32 = arith.constant 64 : i32
    %103 = vector.broadcast %c64_i32 : i32 to vector<8x128xi32>
    %104 = arith.cmpi sge, %80, %103 : vector<8x128xi32>
    %105 = arith.select %104, %102, %91 : vector<8x128xi1>, vector<8x128xf32>
    %c0_74 = arith.constant 0 : index
    %c0_75 = arith.constant 0 : index
    %c0_76 = arith.constant 0 : index
    %106 = vector.load %arg37[%c0_74, %c0_75, %c0_76] : memref<1x8x128xf32, #tpu.memory_space<vmem>>, vector<1x8x128xf32>
    %107 = vector.shape_cast %106 : vector<1x8x128xf32> to vector<8x128xf32>
    %108 = vector.shape_cast %105 : vector<8x128xf32> to vector<1x8x128xf32>
    tpu.vector_store %arg37[%c0_74, %c0_75, %c0_76], %108 {strides = array<i32>} : memref<1x8x128xf32, #tpu.memory_space<vmem>>, vector<1x8x128xf32>,
    %109 = tpu.iota {dimensions = array<i32: 1>} : vector<16x128xi32>
    %c0_77 = arith.constant 0 : index
    %c0_78 = arith.constant 0 : index
    %110 = vector.load %arg11[%c0_77, %c0_78] : memref<16x124xbf16, #tpu.memory_space<vmem>>, vector<16x124xbf16>
    %cst_79 = arith.constant dense<0.000000e+00> : vector<16x1xf32>
    %111 = tpu.matmul %110, %51, %cst_79 {dimension_numbers = #tpu.dot_dimension_numbers<[1], [0], [0], [1], [0, 0, 1, 1], [], []>} : vector<16x124xbf16>, vector<124x1xbf16>, vector<16x1xf32> -> vector<16x1xf32>
    %c0_80 = arith.constant 0 : index
    %c0_81 = arith.constant 0 : index
    %112 = vector.load %arg25[%c0_80, %c0_81] : memref<16x1xf32, #tpu.memory_space<vmem>>, vector<16x1xf32>
    %113 = arith.addf %111, %112 : vector<16x1xf32>
    %114 = arith.negf %113 : vector<16x1xf32>
    %115 = math.exp %114 : vector<16x1xf32>
    %cst_82 = arith.constant 1.000000e+00 : f32
    %116 = vector.broadcast %cst_82 : f32 to vector<16x1xf32>
    %117 = arith.addf %116, %115 : vector<16x1xf32>
    %118 = arith.divf %116, %117 : vector<16x1xf32>
    %119 = vector.shape_cast %118 : vector<16x1xf32> to vector<16x1xf32>
    %120 = vector.broadcast %119 : vector<16x1xf32> to vector<16x128xf32>
    %c0_83 = arith.constant 0 : index
    %c0_84 = arith.constant 0 : index
    %121 = vector.load %arg12[%c0_83, %c0_84] : memref<16x124xbf16, #tpu.memory_space<vmem>>, vector<16x124xbf16>
    %cst_85 = arith.constant dense<0.000000e+00> : vector<16x1xf32>
    %122 = tpu.matmul %121, %51, %cst_85 {dimension_numbers = #tpu.dot_dimension_numbers<[1], [0], [0], [1], [0, 0, 1, 1], [], []>} : vector<16x124xbf16>, vector<124x1xbf16>, vector<16x1xf32> -> vector<16x1xf32>
    %c0_86 = arith.constant 0 : index
    %c0_87 = arith.constant 0 : index
    %123 = vector.load %arg26[%c0_86, %c0_87] : memref<16x1xf32, #tpu.memory_space<vmem>>, vector<16x1xf32>
    %124 = arith.addf %122, %123 : vector<16x1xf32>
    %125 = arith.negf %124 : vector<16x1xf32>
    %126 = math.exp %125 : vector<16x1xf32>
    %cst_88 = arith.constant 1.000000e+00 : f32
    %127 = vector.broadcast %cst_88 : f32 to vector<16x1xf32>
    %128 = arith.addf %127, %126 : vector<16x1xf32>
    %129 = arith.divf %127, %128 : vector<16x1xf32>
    %130 = vector.shape_cast %129 : vector<16x1xf32> to vector<16x1xf32>
    %131 = vector.broadcast %130 : vector<16x1xf32> to vector<16x128xf32>
    %c64_i32_89 = arith.constant 64 : i32
    %132 = vector.broadcast %c64_i32_89 : i32 to vector<16x128xi32>
    %133 = arith.cmpi sge, %109, %132 : vector<16x128xi32>
    %134 = arith.select %133, %131, %120 : vector<16x128xi1>, vector<16x128xf32>
    %c0_90 = arith.constant 0 : index
    %c0_91 = arith.constant 0 : index
    %c0_92 = arith.constant 0 : index
    %135 = vector.load %arg38[%c0_90, %c0_91, %c0_92] : memref<1x16x128xf32, #tpu.memory_space<vmem>>, vector<1x16x128xf32>
    %136 = vector.shape_cast %135 : vector<1x16x128xf32> to vector<16x128xf32>
    %137 = vector.shape_cast %134 : vector<16x128xf32> to vector<1x16x128xf32>
    tpu.vector_store %arg38[%c0_90, %c0_91, %c0_92], %137 {strides = array<i32>} : memref<1x16x128xf32, #tpu.memory_space<vmem>>, vector<1x16x128xf32>,
    %138 = tpu.iota {dimensions = array<i32: 1>} : vector<8x128xi32>
    %c0_93 = arith.constant 0 : index
    %c0_94 = arith.constant 0 : index
    %139 = vector.load %arg13[%c0_93, %c0_94] : memref<8x124xbf16, #tpu.memory_space<vmem>>, vector<8x124xbf16>
    %cst_95 = arith.constant dense<0.000000e+00> : vector<8x1xf32>
    %140 = tpu.matmul %139, %51, %cst_95 {dimension_numbers = #tpu.dot_dimension_numbers<[1], [0], [0], [1], [0, 0, 1, 1], [], []>} : vector<8x124xbf16>, vector<124x1xbf16>, vector<8x1xf32> -> vector<8x1xf32>
    %c0_96 = arith.constant 0 : index
    %c0_97 = arith.constant 0 : index
    %141 = vector.load %arg27[%c0_96, %c0_97] : memref<8x1xf32, #tpu.memory_space<vmem>>, vector<8x1xf32>
    %142 = arith.addf %140, %141 : vector<8x1xf32>
    %143 = arith.negf %142 : vector<8x1xf32>
    %144 = math.exp %143 : vector<8x1xf32>
    %cst_98 = arith.constant 1.000000e+00 : f32
    %145 = vector.broadcast %cst_98 : f32 to vector<8x1xf32>
    %146 = arith.addf %145, %144 : vector<8x1xf32>
    %147 = arith.divf %145, %146 : vector<8x1xf32>
    %148 = vector.shape_cast %147 : vector<8x1xf32> to vector<8x1xf32>
    %149 = vector.broadcast %148 : vector<8x1xf32> to vector<8x128xf32>
    %c0_99 = arith.constant 0 : index
    %c0_100 = arith.constant 0 : index
    %150 = vector.load %arg14[%c0_99, %c0_100] : memref<8x124xbf16, #tpu.memory_space<vmem>>, vector<8x124xbf16>
    %cst_101 = arith.constant dense<0.000000e+00> : vector<8x1xf32>
    %151 = tpu.matmul %150, %51, %cst_101 {dimension_numbers = #tpu.dot_dimension_numbers<[1], [0], [0], [1], [0, 0, 1, 1], [], []>} : vector<8x124xbf16>, vector<124x1xbf16>, vector<8x1xf32> -> vector<8x1xf32>
    %c0_102 = arith.constant 0 : index
    %c0_103 = arith.constant 0 : index
    %152 = vector.load %arg28[%c0_102, %c0_103] : memref<8x1xf32, #tpu.memory_space<vmem>>, vector<8x1xf32>
    %153 = arith.addf %151, %152 : vector<8x1xf32>
    %154 = arith.negf %153 : vector<8x1xf32>
    %155 = math.exp %154 : vector<8x1xf32>
    %cst_104 = arith.constant 1.000000e+00 : f32
    %156 = vector.broadcast %cst_104 : f32 to vector<8x1xf32>
    %157 = arith.addf %156, %155 : vector<8x1xf32>
    %158 = arith.divf %156, %157 : vector<8x1xf32>
    %159 = vector.shape_cast %158 : vector<8x1xf32> to vector<8x1xf32>
    %160 = vector.broadcast %159 : vector<8x1xf32> to vector<8x128xf32>
    %c16_i32 = arith.constant 16 : i32
    %161 = vector.broadcast %c16_i32 : i32 to vector<8x128xi32>
    %162 = arith.cmpi sge, %138, %161 : vector<8x128xi32>
    %163 = arith.select %162, %160, %149 : vector<8x128xi1>, vector<8x128xf32>
    %c0_105 = arith.constant 0 : index
    %c0_106 = arith.constant 0 : index
    %164 = vector.load %arg15[%c0_105, %c0_106] : memref<8x124xbf16, #tpu.memory_space<vmem>>, vector<8x124xbf16>
    %cst_107 = arith.constant dense<0.000000e+00> : vector<8x1xf32>
    %165 = tpu.matmul %164, %51, %cst_107 {dimension_numbers = #tpu.dot_dimension_numbers<[1], [0], [0], [1], [0, 0, 1, 1], [], []>} : vector<8x124xbf16>, vector<124x1xbf16>, vector<8x1xf32> -> vector<8x1xf32>
    %c0_108 = arith.constant 0 : index
    %c0_109 = arith.constant 0 : index
    %166 = vector.load %arg29[%c0_108, %c0_109] : memref<8x1xf32, #tpu.memory_space<vmem>>, vector<8x1xf32>
    %167 = arith.addf %165, %166 : vector<8x1xf32>
    %168 = arith.negf %167 : vector<8x1xf32>
    %169 = math.exp %168 : vector<8x1xf32>
    %cst_110 = arith.constant 1.000000e+00 : f32
    %170 = vector.broadcast %cst_110 : f32 to vector<8x1xf32>
    %171 = arith.addf %170, %169 : vector<8x1xf32>
    %172 = arith.divf %170, %171 : vector<8x1xf32>
    %173 = vector.shape_cast %172 : vector<8x1xf32> to vector<8x1xf32>
    %174 = vector.broadcast %173 : vector<8x1xf32> to vector<8x128xf32>
    %c32_i32 = arith.constant 32 : i32
    %175 = vector.broadcast %c32_i32 : i32 to vector<8x128xi32>
    %176 = arith.cmpi sge, %138, %175 : vector<8x128xi32>
    %177 = arith.select %176, %174, %163 : vector<8x128xi1>, vector<8x128xf32>
    %c0_111 = arith.constant 0 : index
    %c0_112 = arith.constant 0 : index
    %178 = vector.load %arg16[%c0_111, %c0_112] : memref<8x124xbf16, #tpu.memory_space<vmem>>, vector<8x124xbf16>
    %cst_113 = arith.constant dense<0.000000e+00> : vector<8x1xf32>
    %179 = tpu.matmul %178, %51, %cst_113 {dimension_numbers = #tpu.dot_dimension_numbers<[1], [0], [0], [1], [0, 0, 1, 1], [], []>} : vector<8x124xbf16>, vector<124x1xbf16>, vector<8x1xf32> -> vector<8x1xf32>
    %c0_114 = arith.constant 0 : index
    %c0_115 = arith.constant 0 : index
    %180 = vector.load %arg30[%c0_114, %c0_115] : memref<8x1xf32, #tpu.memory_space<vmem>>, vector<8x1xf32>
    %181 = arith.addf %179, %180 : vector<8x1xf32>
    %182 = arith.negf %181 : vector<8x1xf32>
    %183 = math.exp %182 : vector<8x1xf32>
    %cst_116 = arith.constant 1.000000e+00 : f32
    %184 = vector.broadcast %cst_116 : f32 to vector<8x1xf32>
    %185 = arith.addf %184, %183 : vector<8x1xf32>
    %186 = arith.divf %184, %185 : vector<8x1xf32>
    %187 = vector.shape_cast %186 : vector<8x1xf32> to vector<8x1xf32>
    %188 = vector.broadcast %187 : vector<8x1xf32> to vector<8x128xf32>
    %c48_i32 = arith.constant 48 : i32
    %189 = vector.broadcast %c48_i32 : i32 to vector<8x128xi32>
    %190 = arith.cmpi sge, %138, %189 : vector<8x128xi32>
    %191 = arith.select %190, %188, %177 : vector<8x128xi1>, vector<8x128xf32>
    %c0_117 = arith.constant 0 : index
    %c0_118 = arith.constant 0 : index
    %192 = vector.load %arg17[%c0_117, %c0_118] : memref<8x124xbf16, #tpu.memory_space<vmem>>, vector<8x124xbf16>
    %cst_119 = arith.constant dense<0.000000e+00> : vector<8x1xf32>
    %193 = tpu.matmul %192, %51, %cst_119 {dimension_numbers = #tpu.dot_dimension_numbers<[1], [0], [0], [1], [0, 0, 1, 1], [], []>} : vector<8x124xbf16>, vector<124x1xbf16>, vector<8x1xf32> -> vector<8x1xf32>
    %c0_120 = arith.constant 0 : index
    %c0_121 = arith.constant 0 : index
    %194 = vector.load %arg31[%c0_120, %c0_121] : memref<8x1xf32, #tpu.memory_space<vmem>>, vector<8x1xf32>
    %195 = arith.addf %193, %194 : vector<8x1xf32>
    %196 = arith.negf %195 : vector<8x1xf32>
    %197 = math.exp %196 : vector<8x1xf32>
    %cst_122 = arith.constant 1.000000e+00 : f32
    %198 = vector.broadcast %cst_122 : f32 to vector<8x1xf32>
    %199 = arith.addf %198, %197 : vector<8x1xf32>
    %200 = arith.divf %198, %199 : vector<8x1xf32>
    %201 = vector.shape_cast %200 : vector<8x1xf32> to vector<8x1xf32>
    %202 = vector.broadcast %201 : vector<8x1xf32> to vector<8x128xf32>
    %c64_i32_123 = arith.constant 64 : i32
    %203 = vector.broadcast %c64_i32_123 : i32 to vector<8x128xi32>
    %204 = arith.cmpi sge, %138, %203 : vector<8x128xi32>
    %205 = arith.select %204, %202, %191 : vector<8x128xi1>, vector<8x128xf32>
    %c0_124 = arith.constant 0 : index
    %c0_125 = arith.constant 0 : index
    %206 = vector.load %arg18[%c0_124, %c0_125] : memref<8x124xbf16, #tpu.memory_space<vmem>>, vector<8x124xbf16>
    %cst_126 = arith.constant dense<0.000000e+00> : vector<8x1xf32>
    %207 = tpu.matmul %206, %51, %cst_126 {dimension_numbers = #tpu.dot_dimension_numbers<[1], [0], [0], [1], [0, 0, 1, 1], [], []>} : vector<8x124xbf16>, vector<124x1xbf16>, vector<8x1xf32> -> vector<8x1xf32>
    %c0_127 = arith.constant 0 : index
    %c0_128 = arith.constant 0 : index
    %208 = vector.load %arg32[%c0_127, %c0_128] : memref<8x1xf32, #tpu.memory_space<vmem>>, vector<8x1xf32>
    %209 = arith.addf %207, %208 : vector<8x1xf32>
    %210 = arith.negf %209 : vector<8x1xf32>
    %211 = math.exp %210 : vector<8x1xf32>
    %cst_129 = arith.constant 1.000000e+00 : f32
    %212 = vector.broadcast %cst_129 : f32 to vector<8x1xf32>
    %213 = arith.addf %212, %211 : vector<8x1xf32>
    %214 = arith.divf %212, %213 : vector<8x1xf32>
    %215 = vector.shape_cast %214 : vector<8x1xf32> to vector<8x1xf32>
    %216 = vector.broadcast %215 : vector<8x1xf32> to vector<8x128xf32>
    %c80_i32 = arith.constant 80 : i32
    %217 = vector.broadcast %c80_i32 : i32 to vector<8x128xi32>
    %218 = arith.cmpi sge, %138, %217 : vector<8x128xi32>
    %219 = arith.select %218, %216, %205 : vector<8x128xi1>, vector<8x128xf32>
    %c0_130 = arith.constant 0 : index
    %c0_131 = arith.constant 0 : index
    %220 = vector.load %arg19[%c0_130, %c0_131] : memref<8x124xbf16, #tpu.memory_space<vmem>>, vector<8x124xbf16>
    %cst_132 = arith.constant dense<0.000000e+00> : vector<8x1xf32>
    %221 = tpu.matmul %220, %51, %cst_132 {dimension_numbers = #tpu.dot_dimension_numbers<[1], [0], [0], [1], [0, 0, 1, 1], [], []>} : vector<8x124xbf16>, vector<124x1xbf16>, vector<8x1xf32> -> vector<8x1xf32>
    %c0_133 = arith.constant 0 : index
    %c0_134 = arith.constant 0 : index
    %222 = vector.load %arg33[%c0_133, %c0_134] : memref<8x1xf32, #tpu.memory_space<vmem>>, vector<8x1xf32>
    %223 = arith.addf %221, %222 : vector<8x1xf32>
    %224 = arith.negf %223 : vector<8x1xf32>
    %225 = math.exp %224 : vector<8x1xf32>
    %cst_135 = arith.constant 1.000000e+00 : f32
    %226 = vector.broadcast %cst_135 : f32 to vector<8x1xf32>
    %227 = arith.addf %226, %225 : vector<8x1xf32>
    %228 = arith.divf %226, %227 : vector<8x1xf32>
    %229 = vector.shape_cast %228 : vector<8x1xf32> to vector<8x1xf32>
    %230 = vector.broadcast %229 : vector<8x1xf32> to vector<8x128xf32>
    %c96_i32 = arith.constant 96 : i32
    %231 = vector.broadcast %c96_i32 : i32 to vector<8x128xi32>
    %232 = arith.cmpi sge, %138, %231 : vector<8x128xi32>
    %233 = arith.select %232, %230, %219 : vector<8x128xi1>, vector<8x128xf32>
    %c0_136 = arith.constant 0 : index
    %c0_137 = arith.constant 0 : index
    %234 = vector.load %arg20[%c0_136, %c0_137] : memref<8x124xbf16, #tpu.memory_space<vmem>>, vector<8x124xbf16>
    %cst_138 = arith.constant dense<0.000000e+00> : vector<8x1xf32>
    %235 = tpu.matmul %234, %51, %cst_138 {dimension_numbers = #tpu.dot_dimension_numbers<[1], [0], [0], [1], [0, 0, 1, 1], [], []>} : vector<8x124xbf16>, vector<124x1xbf16>, vector<8x1xf32> -> vector<8x1xf32>
    %c0_139 = arith.constant 0 : index
    %c0_140 = arith.constant 0 : index
    %236 = vector.load %arg34[%c0_139, %c0_140] : memref<8x1xf32, #tpu.memory_space<vmem>>, vector<8x1xf32>
    %237 = arith.addf %235, %236 : vector<8x1xf32>
    %238 = arith.negf %237 : vector<8x1xf32>
    %239 = math.exp %238 : vector<8x1xf32>
    %cst_141 = arith.constant 1.000000e+00 : f32
    %240 = vector.broadcast %cst_141 : f32 to vector<8x1xf32>
    %241 = arith.addf %240, %239 : vector<8x1xf32>
    %242 = arith.divf %240, %241 : vector<8x1xf32>
    %243 = vector.shape_cast %242 : vector<8x1xf32> to vector<8x1xf32>
    %244 = vector.broadcast %243 : vector<8x1xf32> to vector<8x128xf32>
    %c112_i32 = arith.constant 112 : i32
    %245 = vector.broadcast %c112_i32 : i32 to vector<8x128xi32>
    %246 = arith.cmpi sge, %138, %245 : vector<8x128xi32>
    %247 = arith.select %246, %244, %233 : vector<8x128xi1>, vector<8x128xf32>
    %c0_142 = arith.constant 0 : index
    %c0_143 = arith.constant 0 : index
    %c0_144 = arith.constant 0 : index
    %248 = vector.load %arg39[%c0_142, %c0_143, %c0_144] : memref<1x8x128xf32, #tpu.memory_space<vmem>>, vector<1x8x128xf32>
    %249 = vector.shape_cast %248 : vector<1x8x128xf32> to vector<8x128xf32>
    %250 = vector.shape_cast %247 : vector<8x128xf32> to vector<1x8x128xf32>
    tpu.vector_store %arg39[%c0_142, %c0_143, %c0_144], %250 {strides = array<i32>} : memref<1x8x128xf32, #tpu.memory_space<vmem>>, vector<1x8x128xf32>,
    return
  }
  func.func @transform_0(%arg0: i32) -> i32 {
    %c0_i32 = arith.constant 0 : i32
    %c0_i32_0 = arith.constant 0 : i32
    return %c0_i32 : i32
  }
  func.func @transform_1(%arg0: i32) -> (i32, i32, i32) {
    %c0_i32 = arith.constant 0 : i32
    %c0_i32_0 = arith.constant 0 : i32
    %c0_i32_1 = arith.constant 0 : i32
    return %arg0, %c0_i32, %c0_i32_0 : i32, i32, i32
  }
  func.func @transform_2(%arg0: i32) -> (i32, i32, i32) {
    %c0_i32 = arith.constant 0 : i32
    %c0_i32_0 = arith.constant 0 : i32
    %c0_i32_1 = arith.constant 0 : i32
    return %arg0, %c0_i32, %c0_i32_0 : i32, i32, i32
  }
  func.func @transform_3(%arg0: i32) -> (i32, i32, i32) {
    %c0_i32 = arith.constant 0 : i32
    %c0_i32_0 = arith.constant 0 : i32
    %c0_i32_1 = arith.constant 0 : i32
    return %arg0, %c0_i32, %c0_i32_0 : i32, i32, i32
  }
  func.func @transform_4(%arg0: i32) -> (i32, i32, i32) {
    %c0_i32 = arith.constant 0 : i32
    %c0_i32_0 = arith.constant 0 : i32
    %c0_i32_1 = arith.constant 0 : i32
    return %arg0, %c0_i32, %c0_i32_0 : i32, i32, i32
  }
  func.func @transform_5(%arg0: i32) -> (i32, i32, i32) {
    %c0_i32 = arith.constant 0 : i32
    %c0_i32_0 = arith.constant 0 : i32
    %c0_i32_1 = arith.constant 0 : i32
    return %arg0, %c0_i32, %c0_i32_0 : i32, i32, i32
  }
  func.func @transform_6(%arg0: i32) -> (i32, i32) {
    %c0_i32 = arith.constant 0 : i32
    %c0_i32_0 = arith.constant 0 : i32
    %c0_i32_1 = arith.constant 0 : i32
    return %c0_i32, %c0_i32_0 : i32, i32
  }
  func.func @transform_7(%arg0: i32) -> (i32, i32) {
    %c0_i32 = arith.constant 0 : i32
    %c0_i32_0 = arith.constant 0 : i32
    %c0_i32_1 = arith.constant 0 : i32
    return %c0_i32, %c0_i32_0 : i32, i32
  }
  func.func @transform_8(%arg0: i32) -> (i32, i32) {
    %c0_i32 = arith.constant 0 : i32
    %c0_i32_0 = arith.constant 0 : i32
    %c0_i32_1 = arith.constant 0 : i32
    return %c0_i32, %c0_i32_0 : i32, i32
  }
  func.func @transform_9(%arg0: i32) -> (i32, i32) {
    %c0_i32 = arith.constant 0 : i32
    %c0_i32_0 = arith.constant 0 : i32
    %c0_i32_1 = arith.constant 0 : i32
    return %c0_i32, %c0_i32_0 : i32, i32
  }
  func.func @transform_10(%arg0: i32) -> (i32, i32) {
    %c0_i32 = arith.constant 0 : i32
    %c0_i32_0 = arith.constant 0 : i32
    %c0_i32_1 = arith.constant 0 : i32
    return %c0_i32, %c0_i32_0 : i32, i32
  }
  func.func @transform_11(%arg0: i32) -> (i32, i32) {
    %c0_i32 = arith.constant 0 : i32
    %c0_i32_0 = arith.constant 0 : i32
    %c0_i32_1 = arith.constant 0 : i32
    return %c0_i32, %c0_i32_0 : i32, i32
  }
  func.func @transform_12(%arg0: i32) -> (i32, i32) {
    %c0_i32 = arith.constant 0 : i32
    %c0_i32_0 = arith.constant 0 : i32
    %c0_i32_1 = arith.constant 0 : i32
    return %c0_i32, %c0_i32_0 : i32, i32
  }
  func.func @transform_13(%arg0: i32) -> (i32, i32) {
    %c0_i32 = arith.constant 0 : i32
    %c0_i32_0 = arith.constant 0 : i32
    %c0_i32_1 = arith.constant 0 : i32
    return %c0_i32, %c0_i32_0 : i32, i32
  }
  func.func @transform_14(%arg0: i32) -> (i32, i32) {
    %c0_i32 = arith.constant 0 : i32
    %c0_i32_0 = arith.constant 0 : i32
    %c0_i32_1 = arith.constant 0 : i32
    return %c0_i32, %c0_i32_0 : i32, i32
  }
  func.func @transform_15(%arg0: i32) -> (i32, i32) {
    %c0_i32 = arith.constant 0 : i32
    %c0_i32_0 = arith.constant 0 : i32
    %c0_i32_1 = arith.constant 0 : i32
    return %c0_i32, %c0_i32_0 : i32, i32
  }
  func.func @transform_16(%arg0: i32) -> (i32, i32) {
    %c0_i32 = arith.constant 0 : i32
    %c0_i32_0 = arith.constant 0 : i32
    %c0_i32_1 = arith.constant 0 : i32
    return %c0_i32, %c0_i32_0 : i32, i32
  }
  func.func @transform_17(%arg0: i32) -> (i32, i32) {
    %c0_i32 = arith.constant 0 : i32
    %c0_i32_0 = arith.constant 0 : i32
    %c0_i32_1 = arith.constant 0 : i32
    return %c0_i32, %c0_i32_0 : i32, i32
  }
  func.func @transform_18(%arg0: i32) -> (i32, i32) {
    %c0_i32 = arith.constant 0 : i32
    %c0_i32_0 = arith.constant 0 : i32
    %c0_i32_1 = arith.constant 0 : i32
    return %c0_i32, %c0_i32_0 : i32, i32
  }
  func.func @transform_19(%arg0: i32) -> (i32, i32) {
    %c0_i32 = arith.constant 0 : i32
    %c0_i32_0 = arith.constant 0 : i32
    %c0_i32_1 = arith.constant 0 : i32
    return %c0_i32, %c0_i32_0 : i32, i32
  }
  func.func @transform_20(%arg0: i32) -> (i32, i32) {
    %c0_i32 = arith.constant 0 : i32
    %c0_i32_0 = arith.constant 0 : i32
    %c0_i32_1 = arith.constant 0 : i32
    return %c0_i32, %c0_i32_0 : i32, i32
  }
  func.func @transform_21(%arg0: i32) -> (i32, i32) {
    %c0_i32 = arith.constant 0 : i32
    %c0_i32_0 = arith.constant 0 : i32
    %c0_i32_1 = arith.constant 0 : i32
    return %c0_i32, %c0_i32_0 : i32, i32
  }
  func.func @transform_22(%arg0: i32) -> (i32, i32) {
    %c0_i32 = arith.constant 0 : i32
    %c0_i32_0 = arith.constant 0 : i32
    %c0_i32_1 = arith.constant 0 : i32
    return %c0_i32, %c0_i32_0 : i32, i32
  }
  func.func @transform_23(%arg0: i32) -> (i32, i32) {
    %c0_i32 = arith.constant 0 : i32
    %c0_i32_0 = arith.constant 0 : i32
    %c0_i32_1 = arith.constant 0 : i32
    return %c0_i32, %c0_i32_0 : i32, i32
  }
  func.func @transform_24(%arg0: i32) -> (i32, i32) {
    %c0_i32 = arith.constant 0 : i32
    %c0_i32_0 = arith.constant 0 : i32
    %c0_i32_1 = arith.constant 0 : i32
    return %c0_i32, %c0_i32_0 : i32, i32
  }
  func.func @transform_25(%arg0: i32) -> (i32, i32) {
    %c0_i32 = arith.constant 0 : i32
    %c0_i32_0 = arith.constant 0 : i32
    %c0_i32_1 = arith.constant 0 : i32
    return %c0_i32, %c0_i32_0 : i32, i32
  }
  func.func @transform_26(%arg0: i32) -> (i32, i32) {
    %c0_i32 = arith.constant 0 : i32
    %c0_i32_0 = arith.constant 0 : i32
    %c0_i32_1 = arith.constant 0 : i32
    return %c0_i32, %c0_i32_0 : i32, i32
  }
  func.func @transform_27(%arg0: i32) -> (i32, i32) {
    %c0_i32 = arith.constant 0 : i32
    %c0_i32_0 = arith.constant 0 : i32
    %c0_i32_1 = arith.constant 0 : i32
    return %c0_i32, %c0_i32_0 : i32, i32
  }
  func.func @transform_28(%arg0: i32) -> (i32, i32) {
    %c0_i32 = arith.constant 0 : i32
    %c0_i32_0 = arith.constant 0 : i32
    %c0_i32_1 = arith.constant 0 : i32
    return %c0_i32, %c0_i32_0 : i32, i32
  }
  func.func @transform_29(%arg0: i32) -> (i32, i32) {
    %c0_i32 = arith.constant 0 : i32
    %c0_i32_0 = arith.constant 0 : i32
    %c0_i32_1 = arith.constant 0 : i32
    return %c0_i32, %c0_i32_0 : i32, i32
  }
  func.func @transform_30(%arg0: i32) -> (i32, i32) {
    %c0_i32 = arith.constant 0 : i32
    %c0_i32_0 = arith.constant 0 : i32
    %c0_i32_1 = arith.constant 0 : i32
    return %c0_i32, %c0_i32_0 : i32, i32
  }
  func.func @transform_31(%arg0: i32) -> (i32, i32) {
    %c0_i32 = arith.constant 0 : i32
    %c0_i32_0 = arith.constant 0 : i32
    %c0_i32_1 = arith.constant 0 : i32
    return %c0_i32, %c0_i32_0 : i32, i32
  }
  func.func @transform_32(%arg0: i32) -> (i32, i32) {
    %c0_i32 = arith.constant 0 : i32
    %c0_i32_0 = arith.constant 0 : i32
    %c0_i32_1 = arith.constant 0 : i32
    return %c0_i32, %c0_i32_0 : i32, i32
  }
  func.func @transform_33(%arg0: i32) -> (i32, i32) {
    %c0_i32 = arith.constant 0 : i32
    %c0_i32_0 = arith.constant 0 : i32
    %c0_i32_1 = arith.constant 0 : i32
    return %c0_i32, %c0_i32_0 : i32, i32
  }
  func.func @transform_34(%arg0: i32) -> (i32, i32, i32) {
    %c0_i32 = arith.constant 0 : i32
    %c0_i32_0 = arith.constant 0 : i32
    %c0_i32_1 = arith.constant 0 : i32
    return %arg0, %c0_i32, %c0_i32_0 : i32, i32, i32
  }
  func.func @transform_35(%arg0: i32) -> (i32, i32, i32) {
    %c0_i32 = arith.constant 0 : i32
    %c0_i32_0 = arith.constant 0 : i32
    %c0_i32_1 = arith.constant 0 : i32
    return %arg0, %c0_i32, %c0_i32_0 : i32, i32, i32
  }
  func.func @transform_36(%arg0: i32) -> (i32, i32, i32) {
    %c0_i32 = arith.constant 0 : i32
    %c0_i32_0 = arith.constant 0 : i32
    %c0_i32_1 = arith.constant 0 : i32
    return %arg0, %c0_i32, %c0_i32_0 : i32, i32, i32
  }
  func.func @transform_37(%arg0: i32) -> (i32, i32, i32) {
    %c0_i32 = arith.constant 0 : i32
    %c0_i32_0 = arith.constant 0 : i32
    %c0_i32_1 = arith.constant 0 : i32
    return %arg0, %c0_i32, %c0_i32_0 : i32, i32, i32
  }
  func.func @transform_38(%arg0: i32) -> (i32, i32, i32) {
    %c0_i32 = arith.constant 0 : i32
    %c0_i32_0 = arith.constant 0 : i32
    %c0_i32_1 = arith.constant 0 : i32
    return %arg0, %c0_i32, %c0_i32_0 : i32, i32, i32
  }
}

</mosaic_0001>

<bundles_post_ra>
// kernel: tpu_custom_call.1
= control target key start
LH: loop header
LB: loop body
LE: loop exit
PB: predicated region body
PF: predicated region fallthrough
CT: control target
= control target key end

     0   :  { %s4269_s6 = smov 1   ;;  %s4270_s10 = smov 2   ;;  %s5277_s0 = inlined_call_operand.smem [shape: u32[39], index: -1, kind: input, shape index: {}] }
   0x1   :  { %s4328_s5 = sld [smem:[%s5277_s0]]   ;;  %s4271_s14 = smov 3  }
   0x2   :  { %s4333_s9 = sld [smem:[%s5277_s0 + %s4269_s6]]   ;;  %s4272_s18 = smov 4  }
   0x3   :  { %s4338_s13 = sld [smem:[%s5277_s0 + %s4270_s10]]   ;;  %s4273_s22 = smov 5  }
   0x4   :  { %s4343_s17 = sld [smem:[%s5277_s0 + %s4271_s14]]   ;;  %s4274_s26 = smov 6  }
   0x5   :  { %s4348_s21 = sld [smem:[%s5277_s0 + %s4272_s18]]   ;;  %s4275_s30 = smov 7  }
   0x6   :  { %s4353_s25 = sld [smem:[%s5277_s0 + %s4273_s22]]   ;;  %s4276_s4 = smov 8  }
   0x7   :  { %5288 = sst [smem:[#allocation17_spill]] %s4328_s5  ;;  %s4277_s10 = smov 9  }
   0x8   :  { %5289 = sst [smem:[#allocation18_spill]] %s4333_s9  ;;  %s4278_s15 = smov 10  }
   0x9   :  { %5290 = sst [smem:[#allocation19_spill]] %s4338_s13  ;;  %s4279_s20 = smov 11  }
   0xa   :  { %5291 = sst [smem:[#allocation20_spill]] %s4343_s17  ;;  %s4281_s1 = smov 13  }
   0xb   :  { %5292 = sst [smem:[#allocation21_spill]] %s4348_s21  ;;  %s4282_s7 = smov 14  }
   0xc   :  { %5293 = sst [smem:[#allocation22_spill]] %s4353_s25  ;;  %s4284_s22 = smov 16  }
   0xd   :  { %s4358_s29 = sld [smem:[%s5277_s0 + %s4274_s26]]   ;;  %s4280_s26 = smov 12  }
   0xe   :  { %s4363_s3 = sld [smem:[%s5277_s0 + %s4275_s30]]   ;;  %s4285_s28 = smov 17  }
   0xf   :  { %s4368_s8 = sld [smem:[%s5277_s0 + %s4276_s4]]  }
  0x10   :  { %s4373_s14 = sld [smem:[%s5277_s0 + %s4277_s10]]  }
  0x11   :  { %s4378_s19 = sld [smem:[%s5277_s0 + %s4278_s15]]   ;;  %s4283_s15 = smov 15  }
  0x12   :  { %s4383_s24 = sld [smem:[%s5277_s0 + %s4279_s20]]  }
  0x13   :  { %s4388_s30 = sld [smem:[%s5277_s0 + %s4280_s26]]  }
  0x14   :  { %5294 = sst [smem:[#allocation23_spill]] %s4363_s3 }
  0x15   :  { %5295 = sst [smem:[#allocation24_spill]] %s4368_s8 }
  0x16   :  { %5296 = sst [smem:[#allocation25_spill]] %s4373_s14 }
  0x17   :  { %5297 = sst [smem:[#allocation26_spill]] %s4378_s19 }
  0x18   :  { %5298 = sst [smem:[#allocation27_spill]] %s4383_s24 }
  0x19   :  { %s4393_s6 = sld [smem:[%s5277_s0 + %s4281_s1]]  }
  0x1a   :  { %s4398_s12 = sld [smem:[%s5277_s0 + %s4282_s7]]   ;;  %s4286_s7 = smov 18  }
  0x1b   :  { %s4403_s20 = sld [smem:[%s5277_s0 + %s4283_s15]]   ;;  %s4287_s15 = smov 19  }
  0x1c   :  { %s4408_s27 = sld [smem:[%s5277_s0 + %s4284_s22]]   ;;  %s4288_s22 = smov 20  }
  0x1d   :  { %s4413_s4 = sld [smem:[%s5277_s0 + %s4285_s28]]   ;;  %s4289_s28 = smov 21  }
  0x1f   :  { %5299 = sst [smem:[#allocation28_spill]] %s4393_s6 }
  0x20   :  { %5300 = sst [smem:[#allocation29_spill]] %s4398_s12 }
  0x21   :  { %5301 = sst [smem:[#allocation30_spill]] %s4403_s20 }
  0x22   :  { %5302 = sst [smem:[#allocation31_spill]] %s4408_s27 }
  0x23   :  { %5303 = sst [smem:[#allocation32_spill]] %s4413_s4 }
  0x24   :  { %s4418_s12 = sld [smem:[%s5277_s0 + %s4286_s7]]   ;;  %s4290_s7 = smov 22  }
  0x25   :  { %s4423_s20 = sld [smem:[%s5277_s0 + %s4287_s15]]   ;;  %s4291_s15 = smov 23  }
  0x26   :  { %s4428_s27 = sld [smem:[%s5277_s0 + %s4288_s22]]   ;;  %s4292_s22 = smov 24  }
  0x27   :  { %s4433_s4 = sld [smem:[%s5277_s0 + %s4289_s28]]   ;;  %s4293_s28 = smov 25  }
  0x2a   :  { %5304 = sst [smem:[#allocation33_spill]] %s4418_s12 }
  0x2b   :  { %5305 = sst [smem:[#allocation34_spill]] %s4423_s20 }
  0x2c   :  { %5306 = sst [smem:[#allocation35_spill]] %s4428_s27 }
  0x2d   :  { %5307 = sst [smem:[#allocation36_spill]] %s4433_s4 }
  0x2e   :  { %s4438_s12 = sld [smem:[%s5277_s0 + %s4290_s7]]   ;;  %s4294_s7 = smov 26  }
  0x2f   :  { %s4443_s20 = sld [smem:[%s5277_s0 + %s4291_s15]]   ;;  %s4295_s15 = smov 27  }
  0x30   :  { %s4448_s27 = sld [smem:[%s5277_s0 + %s4292_s22]]   ;;  %s4296_s22 = smov 28  }
  0x31   :  { %s4453_s4 = sld [smem:[%s5277_s0 + %s4293_s28]]   ;;  %s4297_s28 = smov 29  }
  0x34   :  { %5308 = sst [smem:[#allocation37_spill]] %s4438_s12 }
  0x35   :  { %5309 = sst [smem:[#allocation38_spill]] %s4443_s20 }
  0x36   :  { %5310 = sst [smem:[#allocation39_spill]] %s4448_s27 }
  0x37   :  { %5311 = sst [smem:[#allocation40_spill]] %s4453_s4 }
  0x38   :  { %s4458_s12 = sld [smem:[%s5277_s0 + %s4294_s7]]   ;;  %s4298_s7 = smov 30  }
  0x39   :  { %s4463_s20 = sld [smem:[%s5277_s0 + %s4295_s15]]   ;;  %s4299_s15 = smov 31  }
  0x3a   :  { %s4468_s27 = sld [smem:[%s5277_s0 + %s4296_s22]]   ;;  %s4300_s22 = smov 32  }
  0x3b   :  { %s4473_s4 = sld [smem:[%s5277_s0 + %s4297_s28]]   ;;  %s4301_s28 = smov 33  }
  0x3e   :  { %5312 = sst [smem:[#allocation41_spill]] %s4458_s12 }
  0x3f   :  { %5313 = sst [smem:[#allocation42_spill]] %s4463_s20 }
  0x40   :  { %5314 = sst [smem:[#allocation43_spill]] %s4468_s27 }
  0x41   :  { %5315 = sst [smem:[#allocation44_spill]] %s4473_s4 }
  0x42   :  { %s4478_s12 = sld [smem:[%s5277_s0 + %s4298_s7]]   ;;  %s4302_s7 = smov 34  }
  0x43   :  { %s4483_s20 = sld [smem:[%s5277_s0 + %s4299_s15]]   ;;  %s4303_s15 = smov 35  }
  0x44   :  { %s4488_s27 = sld [smem:[%s5277_s0 + %s4300_s22]]   ;;  %s4304_s22 = smov 36  }
  0x45   :  { %s4493_s4 = sld [smem:[%s5277_s0 + %s4301_s28]]   ;;  %s4305_s28 = smov 37  }
  0x48   :  { %5316 = sst [smem:[#allocation45_spill]] %s4478_s12 }
  0x49   :  { %5317 = sst [smem:[#allocation46_spill]] %s4483_s20 }
  0x4a   :  { %5318 = sst [smem:[#allocation47_spill]] %s4488_s27 }
  0x4b   :  { %5319 = sst [smem:[#allocation48_spill]] %s4493_s4 }
  0x4c   :  { %s4498_s12 = sld [smem:[%s5277_s0 + %s4302_s7]]   ;;  %s4306_s7 = smov 38  }
  0x4d   :  { %s4503_s20 = sld [smem:[%s5277_s0 + %s4303_s15]]  }
  0x4e   :  { %s4508_s27 = sld [smem:[%s5277_s0 + %s4304_s22]]  }
  0x4f   :  { %s4513_s4 = sld [smem:[%s5277_s0 + %s4305_s28]]  }
  0x52   :  { %5320 = sst [smem:[#allocation49_spill]] %s4498_s12 }
  0x53   :  { %5321 = sst [smem:[#allocation50_spill]] %s4503_s20 }
  0x54   :  { %s4518_s12 = sld [smem:[%s5277_s0 + %s4306_s7]]  }
  0x55   :  { %5322 = sst [smem:[#allocation51_spill]] %s4513_s4 }
  0x56   :  { %83 = vsyncpa [#allocation5], 0 }
  0x57   :  { %84 = vsyncpa [#allocation4], 0 }
  0x58   :  { %86 = vsyncpa [#allocation4 + $0x1], 0 }
  0x59   :  { %87 = vsyncpa [#allocation8], 0 }
  0x5a   :  { %89 = vsyncpa [#allocation8 + $0x1], 0 }
  0x5b   :  { %90 = vsyncpa [#allocation11], 0 }
  0x5c   :  { %92 = vsyncpa [#allocation11 + $0x1], 0  ;;  %s4520_s15 = smov 0   ;;  %s4522_s16 = smov 0  }
  0x5d   :  { %s4524_s18 = smov 0   ;;  %s4526_s22 = smov 0  }
  0x5e LB: > { %s5323_s20 = sld [smem:[#allocation50_spill]]  ;;  %s5324_s4 = sld [smem:[#allocation51_spill]]  ;;  %s4259_s16 = sphi %s4522_s16, %s5366_s16   ;;  %s4255_s15 = sphi %s4520_s15, %s5365_s15   ;;  %s4267_s22 = sphi %s4526_s22, %s5368_s22   ;;  %s4263_s18 = sphi %s4524_s18, %s5367_s18  }
  0x5f   : > { %s4541_s0 = sadd.s32 4294967295, %s4267_s22   ;;  %s5282_s23 = sadd.s32 4294967294, %s4267_s22  }
  0x60   : > { %s5325_s5 = sld [smem:[#allocation17_spill]]  ;;  %s4545_s26 = sadd.s32 1, %s4267_s22  }
  0x61   : > { %s844_s28 = sadd.s32 1, %s4263_s18  ;;  %s841_s1 = ssub.s32 %s4267_s22, %s4545_s26 }
  0x62   : > { %p854_p0 = scmp.ne.s32.totalorder %s4263_s18, %s4259_s16  ;;  %p842_p1 = scmp.eq.s32.totalorder %s841_s1, 0 }
  0x63   : > { %p855_p2 = scmp.eq.s32.totalorder %s4541_s0, 1  ;;  %p860_p3 = scmp.ne.s32.totalorder %s4259_s16, %s4255_s15 }
  0x64   : > { %p861_p4 = scmp.eq.s32.totalorder %s5282_s23, 1  ;;  %p3176_p7 = scmp.ge.s32.totalorder %s4267_s22, 1 }
  0x65   : > { %s4558_s2 = scalar_select %p842_p1, %s4263_s18, %s844_s28  }
  0x66   : > { %p4560_p5 = por %p855_p2, %p854_p0  ;;  %p4564_p6 = por %p861_p4, %p860_p3 }
  0x67   : > { %p972_p8 = scmp.lt.s32.totalorder %s4267_s22, 3  ;;  %p3916_p9 = scmp.eq.s32.totalorder %s4541_s0, 0 }
  0x68   : > { %s5326_s7 = scalar_select %p4560_p5, 1, 0 }
  0x69   : > { %s5327_s10 = scalar_select %p4564_p6, 1, 0 }
  0x6a   : > { %p4571_p10 = pnand %p3176_p7, %p972_p8  ;;  %s985_s1 = sshll.u32 %s5325_s5, 4  ;;  %s986_s1 = int_to_ptr.vmem [resolvable:$true] %s985_s1 }
  0x6b   : > { %s4066_s28 = scalar_lea.vmem %s986_s1, 16  ;;  %p4074_p3 = scmp.lt.s32.totalorder %s986_s1, %s986_s1 }
  0x6c   : > { %p3896_p11 = pneg %p4571_p10  ;;  %p4067_p13 = scmp.ne.s32.totalorder %s986_s1, %s4066_s28 }
  0x6d   : > { %p4075_p4 = scmp.lt.s32.totalorder %s4066_s28, %s4066_s28 }
  0x6e   : > { %p3897_p12 = pnand %p3916_p9, %p3896_p11 }
  0x6f   : > { %p4076_p6 = por %p4075_p4, %p4074_p3 }
  0x70   : > { %p4068_p0 = pneg %p3897_p12 }
  0x72   : > { %p4069_p1 = pnand %p4068_p0, %p4067_p13 }
  0x74   : > { %p4070_p2 = pneg %p4069_p1 }
  0x76   : > { %p4077_p5 = pnand %p4076_p6, %p4070_p2 }
  0x78   : > { %4080 = shalt.err (!%p4077_p5)
}
  0x79   : > { %s4307_s23 = smov [#allocation3]   ;;  %1122 = sbr.rel (%p4571_p10) target bundleno = 1022 (0x3fe), region = 156 }
  0x7a   : > { %3899 = dma.vmem_to_smem (!%p3897_p12), %s986_s1, 16, %s4307_s23, [#allocation5]  }
  0x80   : > { %4238 = dma.done.wait (%p3916_p9), [#allocation5], 16  }
  0x81   : > { %4240 = vsyncadd (%p3916_p9), [#allocation5], 4294967280 }
  0x82   : > { %1128 = sfence }
  0x83   : > { %s5329_s9 = sld [smem:[#allocation18_spill]]  ;;  %p1257_p7 = scmp.lt.s32.totalorder %s4541_s0, 1  ;;  %v4308_v0 = vmov 1.0|1.0   ;;  %vm1454_vm0 = vcmask 523264   ;;  %vm1657_vm1 = vcmask 130048  }
  0x84   : > { %3832 = vmatprep.subr.bf16.mxu0 %v4308_v0  ;;  %s5330_s13 = sld [smem:[#allocation19_spill]]  ;;  %3848 = vmatprep.subr.bf16.mxu1 %v4308_v0  ;;  %s5331_s17 = sld [smem:[#allocation20_spill]]  ;;  %vm1283_vm2 = vcmask 7168   ;;  %v4309_v19 = vmov 0.0   ;;  %vm1299_vm3 = vcmask 5120   ;;  %vm4310_vm4 = vmmov 0  }
  0x85   : > { %3833 = vmatpush3.bf16.msra.mxu0 %v4308_v0  ;;  %3849 = vmatpush3.bf16.msra.mxu1 %v4308_v0  ;;  %s4592_s23 = scalar_select %p1257_p7, %s4541_s0, 1  ;;  %1284 = vst.msk [vmem:[#allocation2] sm:$0xff] %vm1283_vm2, %v4309_v19  ;;  %1285 = vst.msk [vmem:[#allocation2 + $0x8] sm:$0xff] %vm1283_vm2, %v4309_v19  ;;  %vm1376_vm5 = vcmask 3072   ;;  %vm1951_vm6 = vcmask 1045504   ;;  %vm1947_vm7 = vcmask 1014784  }
  0x86   : > { %3834 = vmatprep.subr.bf16.mxu0 %v4308_v0  ;;  %3850 = vmatprep.subr.bf16.mxu1 %v4308_v0  ;;  %s5332_s21 = sld [smem:[#allocation21_spill]]  ;;  %s5333_s25 = sld [smem:[#allocation22_spill]]  ;;  %1286 = vst.msk [vmem:[#allocation2 + $0x10] sm:$0xff] %vm1283_vm2, %v4309_v19  ;;  %1287 = vst.msk [vmem:[#allocation2 + $0x18] sm:$0xff] %vm1283_vm2, %v4309_v19 }
  0x87   : > { %s3259_s11 = sshll.u32 %s4592_s23, 3  ;;  %s3260_s28 = sshll.u32 %s4592_s23, 4  ;;  %1288 = vst.msk [vmem:[#allocation2 + $0x20] sm:$0xff] %vm1283_vm2, %v4309_v19  ;;  %1289 = vst.msk [vmem:[#allocation2 + $0x28] sm:$0xff] %vm1283_vm2, %v4309_v19 }
  0x88   : > { %1290 = vst.msk [vmem:[#allocation2 + $0x30] sm:$0xff] %vm1283_vm2, %v4309_v19  ;;  %1291 = vst.msk [vmem:[#allocation2 + $0x38] sm:$0xff] %vm1283_vm2, %v4309_v19  ;;  %s5334_s3 = sld [smem:[#allocation23_spill]]  ;;  %s5335_s8 = sld [smem:[#allocation24_spill]] }
  0x89   : > { %s1261_s1 = scalar_lea.vmem %s5329_s9, %s3259_s11  ;;  %3835 = vmatpush3.bf16.msra.mxu0 %v4308_v0  ;;  %3851 = vmatpush3.bf16.msra.mxu1 %v4308_v0  ;;  %s3262_s11 = sshll.u32 %s4592_s23, 5  ;;  %1292 = vst.msk [vmem:[#allocation2 + $0x40] sm:$0xff] %vm1283_vm2, %v4309_v19  ;;  %1293 = vst.msk [vmem:[#allocation2 + $0x48] sm:$0xff] %vm1283_vm2, %v4309_v19 }
  0x8a   : > { %v1301_v1 = vld [vmem:[%s1261_s1] sm:$0xff]  ;;  %3836 = vmatprep.subr.bf16.mxu0 %v4308_v0  ;;  %3852 = vmatprep.subr.bf16.mxu1 %v4308_v0  ;;  %s1266_s5 = scalar_lea.vmem %s5330_s13, %s3260_s28  ;;  %s1271_s1 = scalar_lea.vmem %s5331_s17, %s3260_s28  ;;  %1294 = vst.msk [vmem:[#allocation2 + $0x50] sm:$0xff] %vm1283_vm2, %v4309_v19  ;;  %1295 = vst.msk [vmem:[#allocation2 + $0x58] sm:$0xff] %vm1283_vm2, %v4309_v19 }
  0x8b   : > { %v1303_v2 = vcombine.high %v1301_v1, %v1301_v1  ;;  %v1379_v3 = vld [vmem:[%s1266_s5 + $0x8] sm:$0xff]  ;;  %v1378_v4 = vld [vmem:[%s1266_s5] sm:$0xff]  ;;  %s3263_s5 = sshll.u32 %s4592_s23, 6  ;;  %1296 = vst.msk [vmem:[#allocation2 + $0x60] sm:$0xff] %vm1283_vm2, %v4309_v19  ;;  %1297 = vst.msk [vmem:[#allocation2 + $0x68] sm:$0xff] %vm1283_vm2, %v4309_v19  ;;  %s3210_s23 = sld [smem:[#allocation3 + $0x1]] }
  0x8c   : > { %1444 = vmatprep.mubr.f32.mxu1 %v1379_v3  ;;  %s4633_s9 = scalar_lea.vmem %s5332_s21, %s3262_s11  ;;  %v1452_v5 = vld [vmem:[%s1271_s1] sm:$0xff]  ;;  %s1281_s28 = scalar_lea.vmem %s5333_s25, %s3263_s5  ;;  %v1453_v7 = vld [vmem:[%s1271_s1 + $0x8] sm:$0xff]  ;;  %1298 = vst.msk [vmem:[#allocation2 + $0x70] sm:$0xff] %vm1283_vm2, %v4309_v19 }
  0x8d   : > { %1369 = vmatprep.mubr.f32.mxu0 %v1303_v2  ;;  %3837 = vmatpush3.bf16.msra.mxu0 %v4308_v0  ;;  %v1540_v6 = vld [vmem:[%s4633_s9] sm:$0xff]  ;;  %v1541_v8 = vld [vmem:[%s4633_s9 + $0x8] sm:$0xff]  ;;  %v1542_v9 = vld [vmem:[%s4633_s9 + $0x10] sm:$0xff]  ;;  %1300 = vst.msk [vmem:[#allocation2 + $0x78] sm:$0x3f] %vm1299_vm3, %v4309_v19  ;;  %s3211_s11 = sld [smem:[#allocation3 + $0x2]] }
  0x8e   : > { %3853 = vmatpush3.bf16.msra.mxu1 %v4308_v0  ;;  %3838 = vmatprep.subr.bf16.mxu0 %v4308_v0  ;;  %v1649_v10 = vld [vmem:[%s1281_s28] sm:$0xff]  ;;  %v1543_v11 = vld [vmem:[%s4633_s9 + $0x18] sm:$0xff]  ;;  %v1650_v12 = vld [vmem:[%s1281_s28 + $0x8] sm:$0xff]  ;;  %s1803_s9 = sld [smem:[#allocation3]]  ;;  %s5336_s14 = sld [smem:[#allocation25_spill]] }
  0x8f   : > { %3854 = vmatprep.subr.bf16.mxu1 %v4308_v0  ;;  %v1651_v13 = vld [vmem:[%s1281_s28 + $0x10] sm:$0xff]  ;;  %v1652_v14 = vld [vmem:[%s1281_s28 + $0x18] sm:$0xff]  ;;  %v1653_v15 = vld [vmem:[%s1281_s28 + $0x20] sm:$0xff]  ;;  %s5337_s19 = sld [smem:[#allocation26_spill]]  ;;  %s5338_s24 = sld [smem:[#allocation27_spill]] }
  0x90   : > { %v1654_v16 = vld [vmem:[%s1281_s28 + $0x28] sm:$0xff]  ;;  %v1655_v17 = vld [vmem:[%s1281_s28 + $0x30] sm:$0xff]  ;;  %v1656_v18 = vld [vmem:[%s1281_s28 + $0x38] sm:$0xff]  ;;  %s5339_s6 = sld [smem:[#allocation28_spill]]  ;;  %s5340_s1 = sld [smem:[#allocation29_spill]] }
  0x91   : > { %3839 = vmatpush3.bf16.msra.mxu0 %v4308_v0  ;;  %v4713_v37 = vstv %s3210_s23  ;;  %s5341_s5 = sld [smem:[#allocation30_spill]]  ;;  %s5342_s28 = sld [smem:[#allocation31_spill]] }
  0x92   : > { %3855 = vmatpush3.bf16.msra.mxu1 %v4308_v0  ;;  %3840 = vmatprep.subr.bf16.mxu0 %v4308_v0  ;;  %s5344_s23 = sld [smem:[#allocation33_spill]]  ;;  %p5360_p6 = scmp.ne.s32.totalorder %s5326_s7, 0 }
  0x93   : > { %3856 = vmatprep.subr.bf16.mxu1 %v4308_v0  ;;  %v4723_v51 = vstv %s3211_s11  ;;  %s5345_s11 = sld [smem:[#allocation34_spill]] }
  0x94   : > { %v4711_v35 = vstv %s1803_s9  ;;  %s5343_s9 = sld [smem:[#allocation32_spill]] }
  0x95   : > { %3841 = vmatpush3.bf16.msra.mxu0 %v4308_v0 }
  0x96   : > { %3857 = vmatpush3.bf16.msra.mxu1 %v4308_v0  ;;  %3842 = vmatprep.subr.bf16.mxu0 %v4308_v0 }
  0x97   : > { %3858 = vmatprep.subr.bf16.mxu1 %v4308_v0 }
  0x99   : > { %3843 = vmatpush3.bf16.msra.mxu0 %v4308_v0 }
  0x9a   : > { %3859 = vmatpush3.bf16.msra.mxu1 %v4308_v0  ;;  %3844 = vmatprep.subr.bf16.mxu0 %v4308_v0 }
  0x9b   : > { %3860 = vmatprep.subr.bf16.mxu1 %v4308_v0 }
  0x9d   : > { %3845 = vmatpush3.bf16.msra.mxu0 %v4308_v0 }
  0x9e   : > { %3861 = vmatpush3.bf16.msra.mxu1 %v4308_v0  ;;  %3846 = vmatprep.subr.bf16.mxu0 %v4308_v0 }
  0x9f   : > { %3862 = vmatprep.subr.bf16.mxu1 %v4308_v0 }
  0xa1   : > { %3847 = vmatpush3.bf16.msra.mxu0 %v4308_v0 }
  0xa2   : > { %3863 = vmatpush3.bf16.msra.mxu1 %v4308_v0  ;;  %3864 = vmatprep.subr.bf16.mxu0 %v4308_v0 }
  0xa3   : > { %3872 = vmatprep.subr.bf16.mxu1 %v4308_v0 }
  0xa4   : > { %1370 = vmatmul.mubr.f32.vlgmr.msra.gmra.mrb[0].mxu0 %v1301_v1 }
  0xa5   : > { %1445 = vmatmul.mubr.f32.vlgmr.msra.gmra.mrb[0].mxu1 %v1378_v4  ;;  %3865 = vmatpush3.bf16.msra.mxu0 %v4308_v0 }
  0xa6   : > { %3873 = vmatpush3.bf16.msra.mxu1 %v4308_v0  ;;  %3866 = vmatprep.subr.bf16.mxu0 %v4308_v0 }
  0xa7   : > { %3874 = vmatprep.subr.bf16.mxu1 %v4308_v0  ;;  %3511 = vmatprep.mubr.msk.f32.mxu0 %vm1454_vm0, %v1452_v5 }
  0xa8   : > { %3530 = vmatprep.mubr.msk.f32.mxu1 %vm1454_vm0, %v1540_v6 }
  0xa9   : > { %3867 = vmatpush3.bf16.msra.mxu0 %v4308_v0 }
  0xaa   : > { %3875 = vmatpush3.bf16.msra.mxu1 %v4308_v0  ;;  %3868 = vmatprep.subr.bf16.mxu0 %v4308_v0 }
  0xab   : > { %3876 = vmatprep.subr.bf16.mxu1 %v4308_v0 }
  0xad   : > { %3869 = vmatpush3.bf16.msra.mxu0 %v4308_v0 }
  0xae   : > { %3877 = vmatpush3.bf16.msra.mxu1 %v4308_v0  ;;  %3870 = vmatprep.subr.bf16.mxu0 %v4308_v0 }
  0xaf   : > { %3878 = vmatprep.subr.bf16.mxu1 %v4308_v0 }
  0xb1   : > { %3871 = vmatpush3.bf16.msra.mxu0 %v4308_v0 }
  0xb2   : > { %3879 = vmatpush3.bf16.msra.mxu1 %v4308_v0  ;;  %3880 = vmatprep.subr.bf16.mxu0 %v4308_v0 }
  0xb3   : > { %3552 = vmatprep.subr.bf16.mxu1 %v4309_v19 }
  0xb4   : > { %3512 = vmatmul.mubr.msk.f32.vlgmr.msra.gmra.mrb[2].mxu0 %vm1454_vm0, %v1453_v7 }
  0xb5   : > { %3531 = vmatmul.mubr.msk.f32.vlgmr.msra.gmra.mrb[2].mxu1 %vm1454_vm0, %v1541_v8  ;;  %3881 = vmatpush3.bf16.msra.mxu0 %v4308_v0 }
  0xb6   : > { %3533 = vmatprep.mubr.msk.f32.mxu1 %vm1454_vm0, %v1542_v9  ;;  %3540 = vmatprep.mubr.msk.f32.mxu0 %vm1657_vm1, %v1649_v10 }
  0xb7   : > { %3572 = vmatprep.subr.bf16.mxu0 %v4309_v19 }
  0xb8   : > { %3541 = vmatmul.mubr.msk.f32.vlgmr.msra.gmra.mrb[4].mxu0 %vm1657_vm1, %v1650_v12 }
  0xb9   : > { %3534 = vmatmul.mubr.msk.f32.gmra.mrb[4].mxu1 %vm1454_vm0, %v1543_v11  ;;  %3543 = vmatprep.mubr.msk.f32.mxu0 %vm1657_vm1, %v1651_v13 }
  0xba   : > { %3568 = vmatprep.mubr.msk.bf16.mxu1 %vm4310_vm4, %v4309_v19 }
  0xbc   : > { %3544 = vmatmul.mubr.msk.f32.gmra.mrb[6].mxu0 %vm1657_vm1, %v1652_v14 }
  0xbd   : > { %3546 = vmatprep.mubr.msk.f32.mxu0 %vm1657_vm1, %v1653_v15 }
  0xc0   : > { %3547 = vmatmul.mubr.msk.f32.gmra.mrb[8].mxu0 %vm1657_vm1, %v1654_v16 }
  0xc1   : > { %3549 = vmatprep.mubr.msk.f32.mxu0 %vm1657_vm1, %v1655_v17 }
  0xc4   : > { %3550 = vmatmul.mubr.msk.f32.gmra.mrb[10].mxu0 %vm1657_vm1, %v1656_v18 }
  0xc5   : > { %3588 = vmatprep.mubr.msk.bf16.mxu0 %vm4310_vm4, %v4309_v19 }
 0x177   : > { %v3299_v20 = vpop.f32.mrb[0].mxu0 }
 0x178   : > { %v3334_v21 = vpop.f32.mrb[0].mxu1  ;;  %v3300_v22 = vpop.f32.mrb[1].mxu0 }
 0x179   : > { %v3335_v23 = vpop.f32.mrb[1].mxu1  ;;  %v3301_v24 = vadd.f32 %v3300_v22, %v3299_v20 }
 0x17a   : > { %v3336_v25 = vadd.f32 %v3335_v23, %v3334_v21 }
 0x17b   : > { %v1375_v26 = vmul.f32 0.00390625, %v3301_v24 }
 0x17c   : > { %v1450_v27 = vmul.f32 0.00390625, %v3336_v25 }
 0x17d   : > { %1377 = vst.msk [vmem:[#allocation2 + $0x1] sm:$0xf] %vm1376_vm5, %v1375_v26 }
 0x17e   : > { %1451 = vst.msk [vmem:[#allocation2 + $0x5] sm:$0xff] %vm1283_vm2, %v1450_v27 }
 0x185   : > { %v1806_v34 = vld [vmem:[#allocation2] sm:$0xff] }
 0x186   : > { %v1839_v36 = vld [vmem:[#allocation2 + $0x1] sm:$0xff]  ;;  %v1823_v42 = vmul.f32 %v4711_v35, %v1806_v34 }
 0x187   : > { %v3513_v28 = vpop.f32.mrb[2].mxu0  ;;  %v1856_v43 = vmul.f32 %v4713_v37, %v1839_v36  ;;  %v1888_v50 = vld [vmem:[#allocation2 + $0x2] sm:$0xff] }
 0x188   : > { %v3532_v29 = vpop.f32.mrb[2].mxu1  ;;  %v1537_v30 = vmul.f32 0.015625, %v3513_v28  ;;  %v1527_v32 = vpop.f32.mrb[3].mxu0  ;;  %v1905_v57 = vmul.f32 %v4723_v51, %v1888_v50 }
 0x189   : > { %v1642_v31 = vmul.f32 0.015625, %v3532_v29  ;;  %v1622_v33 = vpop.f32.mrb[3].mxu1  ;;  %v1536_v38 = vmul.f32 0.015625, %v1527_v32  ;;  %v1872_v53 = vadd.f32 %v1856_v43, %v1823_v42 }
 0x18a   : > { %v1641_v39 = vmul.f32 0.015625, %v1622_v33  ;;  %1539 = vst.msk [vmem:[#allocation2 + $0x15] sm:$0xff] %vm1283_vm2, %v1537_v30 }
 0x18b   : > { %1646 = vst.msk [vmem:[#allocation2 + $0x25] sm:$0xff] %vm1283_vm2, %v1642_v31  ;;  %1538 = vst.msk [vmem:[#allocation2 + $0xd] sm:$0xff] %vm1283_vm2, %v1536_v38  ;;  %v3542_v41 = vpop.f32.mrb[4].mxu0  ;;  %v1921_v4 = vadd.f32 %v1905_v57, %v1872_v53 }
 0x18c   : > { %1645 = vst.msk [vmem:[#allocation2 + $0x1d] sm:$0xff] %vm1283_vm2, %v1641_v39  ;;  %v3535_v40 = vpop.f32.mrb[4].mxu1  ;;  %v1788_v46 = vmul.f32 0.0625, %v3542_v41  ;;  %v1748_v47 = vpop.f32.mrb[5].mxu0 }
 0x18d   : > { %v1644_v44 = vmul.f32 0.015625, %v3535_v40  ;;  %v1632_v45 = vpop.f32.mrb[5].mxu1  ;;  %v1787_v49 = vmul.f32 0.0625, %v1748_v47 }
 0x18e   : > { %v1643_v48 = vmul.f32 0.015625, %v1632_v45  ;;  %1796 = vst.msk [vmem:[#allocation2 + $0x45] sm:$0xff] %vm1283_vm2, %v1788_v46 }
 0x18f   : > { %1648 = vst.msk [vmem:[#allocation2 + $0x35] sm:$0xff] %vm1283_vm2, %v1644_v44  ;;  %1795 = vst.msk [vmem:[#allocation2 + $0x3d] sm:$0xff] %vm1283_vm2, %v1787_v49  ;;  %v3545_v52 = vpop.f32.mrb[6].mxu0 }
 0x190   : > { %1647 = vst.msk [vmem:[#allocation2 + $0x2d] sm:$0xff] %vm1283_vm2, %v1643_v48  ;;  %v1790_v54 = vmul.f32 0.0625, %v3545_v52  ;;  %v1758_v55 = vpop.f32.mrb[7].mxu0 }
 0x191   : > { %v1789_v56 = vmul.f32 0.0625, %v1758_v55 }
 0x192   : > { %v1807_v58 = vld [vmem:[#allocation2 + $0x8] sm:$0xff]  ;;  %v1808_v59 = vld [vmem:[#allocation2 + $0x10] sm:$0xff]  ;;  %1798 = vst.msk [vmem:[#allocation2 + $0x55] sm:$0xff] %vm1283_vm2, %v1790_v54 }
 0x193   : > { %v1840_v60 = vld [vmem:[#allocation2 + $0x9] sm:$0xff]  ;;  %v1824_v61 = vmul.f32 %v4711_v35, %v1807_v58  ;;  %v1825_v62 = vmul.f32 %v4711_v35, %v1808_v59  ;;  %v1841_v63 = vld [vmem:[#allocation2 + $0x11] sm:$0xff]  ;;  %1797 = vst.msk [vmem:[#allocation2 + $0x4d] sm:$0xff] %vm1283_vm2, %v1789_v56  ;;  %v3548_v3 = vpop.f32.mrb[8].mxu0  ;;  %v1810_v8 = vld [vmem:[#allocation2 + $0x20] sm:$0xff] }
 0x194   : > { %v1857_v0 = vmul.f32 %v4713_v37, %v1840_v60  ;;  %v1889_v1 = vld [vmem:[#allocation2 + $0xa] sm:$0xff]  ;;  %v1890_v2 = vld [vmem:[#allocation2 + $0x12] sm:$0xff]  ;;  %v1858_v5 = vmul.f32 %v4713_v37, %v1841_v63  ;;  %v1792_v10 = vmul.f32 0.0625, %v3548_v3  ;;  %v1768_v11 = vpop.f32.mrb[9].mxu0  ;;  %v1843_v15 = vld [vmem:[#allocation2 + $0x21] sm:$0xff]  ;;  %v1827_v20 = vmul.f32 %v4711_v35, %v1810_v8 }
 0x195   : > { %v1906_v6 = vmul.f32 %v4723_v51, %v1889_v1  ;;  %v1809_v7 = vld [vmem:[#allocation2 + $0x18] sm:$0xff]  ;;  %v1907_v13 = vmul.f32 %v4723_v51, %v1890_v2  ;;  %v1860_v21 = vmul.f32 %v4713_v37, %v1843_v15  ;;  %v1892_v28 = vld [vmem:[#allocation2 + $0x22] sm:$0xff] }
 0x196   : > { %v1842_v9 = vld [vmem:[#allocation2 + $0x19] sm:$0xff]  ;;  %v1873_v12 = vadd.f32 %v1857_v0, %v1824_v61  ;;  %v1826_v14 = vmul.f32 %v4711_v35, %v1809_v7  ;;  %v1874_v18 = vadd.f32 %v1858_v5, %v1825_v62  ;;  %1800 = vst.msk [vmem:[#allocation2 + $0x65] sm:$0xff] %vm1283_vm2, %v1792_v10  ;;  %v1847_v46 = vld [vmem:[#allocation2 + $0x41] sm:$0xff]  ;;  %v1909_v48 = vmul.f32 %v4723_v51, %v1892_v28 }
 0x197   : > { %v1859_v16 = vmul.f32 %v4713_v37, %v1842_v9  ;;  %v1891_v17 = vld [vmem:[#allocation2 + $0x1a] sm:$0xff]  ;;  %v1811_v23 = vld [vmem:[#allocation2 + $0x28] sm:$0xff]  ;;  %v1812_v24 = vld [vmem:[#allocation2 + $0x30] sm:$0xff]  ;;  %v3551_v33 = vpop.f32.mrb[10].mxu0  ;;  %v1876_v47 = vadd.f32 %v1860_v21, %v1827_v20  ;;  %v1864_v61 = vmul.f32 %v4713_v37, %v1847_v46  ;;  %v1791_v9 = vmul.f32 0.0625, %v1768_v11 }
 0x198   : > { %v1908_v22 = vmul.f32 %v4723_v51, %v1891_v17  ;;  %v1844_v25 = vld [vmem:[#allocation2 + $0x29] sm:$0xff]  ;;  %v1922_v26 = vadd.f32 %v1906_v6, %v1873_v12  ;;  %v1828_v29 = vmul.f32 %v4711_v35, %v1811_v23  ;;  %v1829_v30 = vmul.f32 %v4711_v35, %v1812_v24  ;;  %v1845_v31 = vld [vmem:[#allocation2 + $0x31] sm:$0xff]  ;;  %v1846_v41 = vld [vmem:[#allocation2 + $0x39] sm:$0xff]  ;;  %v1778_v42 = vpop.f32.mrb[11].mxu0 }
 0x199   : > { %v1875_v27 = vadd.f32 %v1859_v16, %v1826_v14  ;;  %v1893_v32 = vld [vmem:[#allocation2 + $0x2a] sm:$0xff]  ;;  %v1923_v34 = vadd.f32 %v1907_v13, %v1874_v18  ;;  %v1861_v36 = vmul.f32 %v4713_v37, %v1844_v25  ;;  %v1862_v38 = vmul.f32 %v4713_v37, %v1845_v31  ;;  %v1894_v39 = vld [vmem:[#allocation2 + $0x32] sm:$0xff]  ;;  %v1814_v45 = vld [vmem:[#allocation2 + $0x40] sm:$0xff]  ;;  %1799 = vst.msk [vmem:[#allocation2 + $0x5d] sm:$0xff] %vm1283_vm2, %v1791_v9 }
 0x19a   : > { %v1813_v40 = vld [vmem:[#allocation2 + $0x38] sm:$0xff]  ;;  %v4746_v43 = vpack.c.bf16 %v1922_v26, %v1921_v4  ;;  %v1815_v53 = vld [vmem:[#allocation2 + $0x48] sm:$0xff]  ;;  %v1910_v55 = vmul.f32 %v4723_v51, %v1893_v32  ;;  %v1911_v56 = vmul.f32 %v4723_v51, %v1894_v39  ;;  %v1863_v57 = vmul.f32 %v4713_v37, %v1846_v41  ;;  %v1816_v7 = vld [vmem:[#allocation2 + $0x50] sm:$0xff] }
 0x19b   : > { %v1924_v44 = vadd.f32 %v1908_v22, %v1875_v27  ;;  %v1877_v49 = vadd.f32 %v1861_v36, %v1828_v29  ;;  %v1830_v50 = vmul.f32 %v4711_v35, %v1813_v40  ;;  %v1895_v52 = vld [vmem:[#allocation2 + $0x3a] sm:$0xff]  ;;  %v1878_v54 = vadd.f32 %v1862_v38, %v1829_v30  ;;  %v1848_v58 = vld [vmem:[#allocation2 + $0x49] sm:$0xff]  ;;  %v1849_v8 = vld [vmem:[#allocation2 + $0x51] sm:$0xff] }
 0x19c   : > { %3553 = vmatpush3.bf16.msra.mxu1 %v4746_v43  ;;  %v1831_v60 = vmul.f32 %v4711_v35, %v1814_v45  ;;  %3573 = vmatpush3.bf16.msra.mxu0 %v4746_v43  ;;  %v1896_v0 = vld [vmem:[#allocation2 + $0x42] sm:$0xff]  ;;  %v1912_v1 = vmul.f32 %v4723_v51, %v1895_v52  ;;  %v1832_v2 = vmul.f32 %v4711_v35, %v1815_v53  ;;  %v1897_v4 = vld [vmem:[#allocation2 + $0x4a] sm:$0xff]  ;;  %v1794_v13 = vmul.f32 0.0625, %v3551_v33  ;;  %v1898_v21 = vld [vmem:[#allocation2 + $0x52] sm:$0xff] }
 0x19d   : > { %v4754_v59 = vpack.c.bf16 %v1924_v44, %v1923_v34  ;;  %v1926_v62 = vadd.f32 %v1910_v55, %v1877_v49  ;;  %v1879_v63 = vadd.f32 %v1863_v57, %v1830_v50  ;;  %3554 = vmatprep.subr.bf16.mxu1 %v4309_v19  ;;  %v1865_v3 = vmul.f32 %v4713_v37, %v1848_v58 }
 0x19e   : > { %3574 = vmatprep.subr.bf16.mxu0 %v4309_v19  ;;  %v1925_v5 = vadd.f32 %v1909_v48, %v1876_v47  ;;  %v1927_v6 = vadd.f32 %v1911_v56, %v1878_v54  ;;  %v1880_v10 = vadd.f32 %v1864_v61, %v1831_v60  ;;  %v1913_v12 = vmul.f32 %v4723_v51, %v1896_v0 }
 0x19f   : > { %v1793_v14 = vmul.f32 0.0625, %v1778_v42  ;;  %v1928_v16 = vadd.f32 %v1912_v1, %v1879_v63  ;;  %v1881_v17 = vadd.f32 %v1865_v3, %v1832_v2  ;;  %v1914_v18 = vmul.f32 %v4723_v51, %v1897_v4  ;;  %1802 = vst.msk [vmem:[#allocation2 + $0x75] sm:$0xff] %vm1283_vm2, %v1794_v13  ;;  %v2014_v13 = vld [vmem:[%s5334_s3] sm:$0xf] }
 0x1a0   : > { %3555 = vmatpush3.bf16.msra.mxu1 %v4754_v59  ;;  %3575 = vmatpush3.bf16.msra.mxu0 %v4754_v59  ;;  %v4768_v15 = vpack.c.bf16 %v1926_v62, %v1925_v5  ;;  %v1833_v11 = vmul.f32 %v4711_v35, %v1816_v7  ;;  %v1866_v20 = vmul.f32 %v4713_v37, %v1849_v8  ;;  %v1817_v27 = vld [vmem:[#allocation2 + $0x58] sm:$0xff]  ;;  %v1818_v28 = vld [vmem:[#allocation2 + $0x60] sm:$0xff] }
 0x1a1   : > { %3556 = vmatprep.subr.bf16.mxu1 %v4309_v19  ;;  %3576 = vmatprep.subr.bf16.mxu0 %v4309_v19  ;;  %1801 = vst.msk [vmem:[#allocation2 + $0x6d] sm:$0xff] %vm1283_vm2, %v1793_v14  ;;  %v1929_v22 = vadd.f32 %v1913_v12, %v1880_v10  ;;  %v4780_v23 = vpack.c.bf16 %v1928_v16, %v1927_v6  ;;  %v1850_v29 = vld [vmem:[#allocation2 + $0x59] sm:$0xff]  ;;  %v1851_v33 = vld [vmem:[#allocation2 + $0x61] sm:$0xff] }
 0x1a2   : > { %v1930_v24 = vadd.f32 %v1914_v18, %v1881_v17  ;;  %v1882_v25 = vadd.f32 %v1866_v20, %v1833_v11  ;;  %v1915_v26 = vmul.f32 %v4723_v51, %v1898_v21  ;;  %v1834_v31 = vmul.f32 %v4711_v35, %v1817_v27  ;;  %v1899_v36 = vld [vmem:[#allocation2 + $0x5a] sm:$0xff]  ;;  %v1900_v38 = vld [vmem:[#allocation2 + $0x62] sm:$0xff] }
 0x1a3   : > { %v1835_v32 = vmul.f32 %v4711_v35, %v1818_v28  ;;  %v1867_v34 = vmul.f32 %v4713_v37, %v1850_v29  ;;  %v1868_v40 = vmul.f32 %v4713_v37, %v1851_v33  ;;  %v1916_v41 = vmul.f32 %v4723_v51, %v1899_v36  ;;  %v1945_v12 = vld [vmem:[%s4358_s29] sm:$0x3] }
 0x1a4   : > { %3557 = vmatpush3.bf16.msra.mxu1 %v4768_v15  ;;  %3577 = vmatpush3.bf16.msra.mxu0 %v4768_v15  ;;  %v4787_v30 = vpack.c.bf16 %v1930_v24, %v1929_v22  ;;  %v1931_v39 = vadd.f32 %v1915_v26, %v1882_v25  ;;  %v1917_v42 = vmul.f32 %v4723_v51, %v1900_v38  ;;  %v2074_v14 = vld [vmem:[%s5335_s8] sm:$0xf]  ;;  %v4311_v21 = vmov 0  }
 0x1a5   : > { %3558 = vmatprep.subr.bf16.mxu1 %v4309_v19  ;;  %3578 = vmatprep.subr.bf16.mxu0 %v4309_v19  ;;  %v1883_v47 = vadd.f32 %v1867_v34, %v1834_v31  ;;  %v1884_v55 = vadd.f32 %v1868_v40, %v1835_v32  ;;  %v2130_v16 = vld [vmem:[%s5336_s14] sm:$0xf] }
 0x1a6   : > { %v1821_v44 = vld [vmem:[#allocation2 + $0x78] sm:$0xf]  ;;  %v4000_v17 = vld [vmem:[%s5337_s19] sm:$0xff]   ;;  %3997 = vset.pattern.permute.xlu0 %v4311_v21  ;;  %3998 = vset.pattern.permute.xlu1 %v4311_v21 }
 0x1a7   : > { %v1854_v45 = vld [vmem:[#allocation2 + $0x79] sm:$0xf]  ;;  %v1838_v48 = vmul.f32 %v4711_v35, %v1821_v44  ;;  %v1932_v63 = vadd.f32 %v1916_v41, %v1883_v47  ;;  %v4001_v18 = vld [vmem:[%s5338_s24] sm:$0xff]  }
 0x1a8   : > { %3559 = vmatpush3.bf16.msra.mxu1 %v4780_v23  ;;  %3579 = vmatpush3.bf16.msra.mxu0 %v4780_v23  ;;  %v1903_v46 = vld [vmem:[#allocation2 + $0x7a] sm:$0xf]  ;;  %v1871_v49 = vmul.f32 %v4713_v37, %v1854_v45  ;;  %v1819_v52 = vld [vmem:[#allocation2 + $0x68] sm:$0xff]  ;;  %v1820_v53 = vld [vmem:[#allocation2 + $0x70] sm:$0xff] }
 0x1a9   : > { %3560 = vmatprep.subr.bf16.mxu1 %v4309_v19  ;;  %3580 = vmatprep.subr.bf16.mxu0 %v4309_v19  ;;  %v1920_v50 = vmul.f32 %v4723_v51, %v1903_v46  ;;  %v1852_v54 = vld [vmem:[#allocation2 + $0x69] sm:$0xff]  ;;  %v1836_v56 = vmul.f32 %v4711_v35, %v1819_v52  ;;  %v1837_v57 = vmul.f32 %v4711_v35, %v1820_v53  ;;  %v1853_v58 = vld [vmem:[#allocation2 + $0x71] sm:$0xff]  ;;  %v2343_v11 = vld [vmem:[%s4388_s30] sm:$0xf] }
 0x1aa   : > { %v1869_v60 = vmul.f32 %v4713_v37, %v1852_v54  ;;  %v1901_v61 = vld [vmem:[#allocation2 + $0x6a] sm:$0xff]  ;;  %v1902_v62 = vld [vmem:[#allocation2 + $0x72] sm:$0xff]  ;;  %v1887_v0 = vadd.f32 %v1871_v49, %v1838_v48  ;;  %v1870_v1 = vmul.f32 %v4713_v37, %v1853_v58  ;;  %v1933_v35 = vadd.f32 %v1917_v42, %v1884_v55  ;;  %v2399_v20 = vld [vmem:[%s5339_s6] sm:$0xf] }
 0x1ab   : > { %v1918_v2 = vmul.f32 %v4723_v51, %v1901_v61  ;;  %v1919_v4 = vmul.f32 %v4723_v51, %v1902_v62  ;;  %v4809_v5 = vpack.c.bf16 %v1932_v63, %v1931_v39  ;;  %v2457_v22 = vld [vmem:[%s5340_s1] sm:$0xf]  ;;  %s5346_s1 = sld [smem:[#allocation35_spill]] }
 0x1ac   : > { %3561 = vmatpush3.bf16.msra.mxu1 %v4787_v30  ;;  %3581 = vmatpush3.bf16.msra.mxu0 %v4787_v30  ;;  %v1885_v3 = vadd.f32 %v1869_v60, %v1836_v56  ;;  %v1886_v6 = vadd.f32 %v1870_v1, %v1837_v57  ;;  %v1936_v7 = vadd.f32 %v1920_v50, %v1887_v0  ;;  %v2515_v24 = vld [vmem:[%s5341_s5] sm:$0xf]  ;;  %s5347_s5 = sld [smem:[#allocation36_spill]] }
 0x1ad   : > { %3562 = vmatprep.subr.bf16.mxu1 %v4309_v19  ;;  %3582 = vmatprep.subr.bf16.mxu0 %v4309_v19  ;;  %v2573_v25 = vld [vmem:[%s5342_s28] sm:$0xf]  ;;  %s5348_s28 = sld [smem:[#allocation37_spill]] }
 0x1ae   : > { %v1934_v8 = vadd.f32 %v1918_v2, %v1885_v3  ;;  %v1935_v9 = vadd.f32 %v1919_v4, %v1886_v6  ;;  %v2630_v26 = vld [vmem:[%s5343_s9] sm:$0xf]  ;;  %s5349_s9 = sld [smem:[#allocation39_spill]] }
 0x1b0   : > { %3563 = vmatpush3.bf16.msra.mxu1 %v4809_v5  ;;  %3583 = vmatpush3.bf16.msra.mxu0 %v4809_v5  ;;  %v4815_v37 = vpack.c.bf16 %v1934_v8, %v1933_v35  ;;  %v1944_v51 = vpack.c.bf16 %v1936_v7, %v1935_v9 }
 0x1b1   : > { %3564 = vmatprep.subr.bf16.mxu1 %v4309_v19  ;;  %3584 = vmatprep.subr.bf16.mxu0 %v4309_v19 }
 0x1b2   : > { %v4821_v10 = vsel %vm1951_vm6, %v1944_v51, 0 }
 0x1b3   : > { %v2075_v47 = vld [vmem:[%s5348_s28] sm:$0xff]  ;;  %s5354_s28 = sld [smem:[#allocation44_spill]] }
 0x1b4   : > { %3565 = vmatpush3.bf16.msra.mxu1 %v4815_v37  ;;  %3585 = vmatpush3.bf16.msra.mxu0 %v4815_v37  ;;  %v2191_v63 = vld [vmem:[%s5349_s9] sm:$0xff]  ;;  %v2192_v2 = vld [vmem:[%s5349_s9 + $0x8] sm:$0xff]  ;;  %s3265_s9 = sshll.u32 %s4541_s0, 8 }
 0x1b5   : > { %3566 = vmatprep.subr.bf16.mxu1 %v4309_v19  ;;  %3586 = vmatprep.subr.bf16.mxu0 %v4309_v19  ;;  %s5122_s13 = scalar_lea.hbm %s5323_s20, %s3265_s9 }
 0x1b8   : > { %3567 = vmatpush3.bf16.msra.mxu1 %v4821_v10  ;;  %3587 = vmatpush3.bf16.msra.mxu0 %v4821_v10 }
 0x1b9   : > { %3592 = vmatprep.subr.bf16.mxu1 %v4309_v19  ;;  %3612 = vmatprep.subr.bf16.mxu0 %v4309_v19 }
 0x1bb   : > { %3569 = vmatmul.mubr.msk.bf16.vlgmr.msra.gmra.mrb[8].mxu1 %vm1947_vm7, %v1945_v12  ;;  %3589 = vmatmul.mubr.msk.bf16.vlgmr.msra.gmra.mrb[12].mxu0 %vm1947_vm7, %v2014_v13 }
 0x1bc   : > { %3593 = vmatpush3.bf16.msra.mxu1 %v4746_v43  ;;  %3613 = vmatpush3.bf16.msra.mxu0 %v4746_v43 }
 0x1bd   : > { %3594 = vmatprep.subr.bf16.mxu1 %v4309_v19  ;;  %3614 = vmatprep.subr.bf16.mxu0 %v4309_v19 }
 0x1be   : > { %3608 = vmatprep.mubr.msk.bf16.mxu1 %vm4310_vm4, %v4309_v19  ;;  %3628 = vmatprep.mubr.msk.bf16.mxu0 %vm4310_vm4, %v4309_v19 }
 0x1c0   : > { %3595 = vmatpush3.bf16.msra.mxu1 %v4754_v59  ;;  %3615 = vmatpush3.bf16.msra.mxu0 %v4754_v59 }
 0x1c1   : > { %3596 = vmatprep.subr.bf16.mxu1 %v4309_v19  ;;  %3616 = vmatprep.subr.bf16.mxu0 %v4309_v19 }
 0x1c4   : > { %3597 = vmatpush3.bf16.msra.mxu1 %v4768_v15  ;;  %3617 = vmatpush3.bf16.msra.mxu0 %v4768_v15 }
 0x1c5   : > { %3598 = vmatprep.subr.bf16.mxu1 %v4309_v19  ;;  %3618 = vmatprep.subr.bf16.mxu0 %v4309_v19 }
 0x1c8   : > { %3599 = vmatpush3.bf16.msra.mxu1 %v4780_v23  ;;  %3619 = vmatpush3.bf16.msra.mxu0 %v4780_v23 }
 0x1c9   : > { %3600 = vmatprep.subr.bf16.mxu1 %v4309_v19  ;;  %3620 = vmatprep.subr.bf16.mxu0 %v4309_v19 }
 0x1cc   : > { %3601 = vmatpush3.bf16.msra.mxu1 %v4787_v30  ;;  %3621 = vmatpush3.bf16.msra.mxu0 %v4787_v30 }
 0x1cd   : > { %3602 = vmatprep.subr.bf16.mxu1 %v4309_v19  ;;  %3622 = vmatprep.subr.bf16.mxu0 %v4309_v19 }
 0x1d0   : > { %3603 = vmatpush3.bf16.msra.mxu1 %v4809_v5  ;;  %3623 = vmatpush3.bf16.msra.mxu0 %v4809_v5 }
 0x1d1   : > { %3604 = vmatprep.subr.bf16.mxu1 %v4309_v19  ;;  %3624 = vmatprep.subr.bf16.mxu0 %v4309_v19 }
 0x1d4   : > { %3605 = vmatpush3.bf16.msra.mxu1 %v4815_v37  ;;  %3625 = vmatpush3.bf16.msra.mxu0 %v4815_v37 }
 0x1d5   : > { %3606 = vmatprep.subr.bf16.mxu1 %v4309_v19  ;;  %3626 = vmatprep.subr.bf16.mxu0 %v4309_v19 }
 0x1d8   : > { %3607 = vmatpush3.bf16.msra.mxu1 %v4821_v10  ;;  %3627 = vmatpush3.bf16.msra.mxu0 %v4821_v10 }
 0x1d9   : > { %3632 = vmatprep.subr.bf16.mxu1 %v4309_v19  ;;  %3652 = vmatprep.subr.bf16.mxu0 %v4309_v19 }
 0x1db   : > { %3609 = vmatmul.mubr.msk.bf16.vlgmr.msra.gmra.mrb[12].mxu1 %vm1947_vm7, %v2074_v14  ;;  %3629 = vmatmul.mubr.msk.bf16.vlgmr.msra.gmra.mrb[16].mxu0 %vm1947_vm7, %v2130_v16 }
 0x1dc   : > { %3633 = vmatpush3.bf16.msra.mxu1 %v4746_v43  ;;  %3653 = vmatpush3.bf16.msra.mxu0 %v4746_v43 }
 0x1dd   : > { %3634 = vmatprep.subr.bf16.mxu1 %v4309_v19  ;;  %3654 = vmatprep.subr.bf16.mxu0 %v4309_v19 }
 0x1de   : > { %3648 = vmatprep.mubr.msk.bf16.mxu1 %vm4310_vm4, %v4309_v19  ;;  %3668 = vmatprep.mubr.msk.bf16.mxu0 %vm4310_vm4, %v4309_v19 }
 0x1e0   : > { %3635 = vmatpush3.bf16.msra.mxu1 %v4754_v59  ;;  %3655 = vmatpush3.bf16.msra.mxu0 %v4754_v59 }
 0x1e1   : > { %3636 = vmatprep.subr.bf16.mxu1 %v4309_v19  ;;  %3656 = vmatprep.subr.bf16.mxu0 %v4309_v19 }
 0x1e4   : > { %3637 = vmatpush3.bf16.msra.mxu1 %v4768_v15  ;;  %3657 = vmatpush3.bf16.msra.mxu0 %v4768_v15 }
 0x1e5   : > { %3638 = vmatprep.subr.bf16.mxu1 %v4309_v19  ;;  %3658 = vmatprep.subr.bf16.mxu0 %v4309_v19 }
 0x1e8   : > { %3639 = vmatpush3.bf16.msra.mxu1 %v4780_v23  ;;  %3659 = vmatpush3.bf16.msra.mxu0 %v4780_v23 }
 0x1e9   : > { %3640 = vmatprep.subr.bf16.mxu1 %v4309_v19  ;;  %3660 = vmatprep.subr.bf16.mxu0 %v4309_v19 }
 0x1ec   : > { %3641 = vmatpush3.bf16.msra.mxu1 %v4787_v30  ;;  %3661 = vmatpush3.bf16.msra.mxu0 %v4787_v30 }
 0x1ed   : > { %3642 = vmatprep.subr.bf16.mxu1 %v4309_v19  ;;  %3662 = vmatprep.subr.bf16.mxu0 %v4309_v19 }
 0x1f0   : > { %3643 = vmatpush3.bf16.msra.mxu1 %v4809_v5  ;;  %3663 = vmatpush3.bf16.msra.mxu0 %v4809_v5 }
 0x1f1   : > { %3644 = vmatprep.subr.bf16.mxu1 %v4309_v19  ;;  %3664 = vmatprep.subr.bf16.mxu0 %v4309_v19 }
 0x1f4   : > { %3645 = vmatpush3.bf16.msra.mxu1 %v4815_v37  ;;  %3665 = vmatpush3.bf16.msra.mxu0 %v4815_v37 }
 0x1f5   : > { %3646 = vmatprep.subr.bf16.mxu1 %v4309_v19  ;;  %3666 = vmatprep.subr.bf16.mxu0 %v4309_v19 }
 0x1f8   : > { %3647 = vmatpush3.bf16.msra.mxu1 %v4821_v10  ;;  %3667 = vmatpush3.bf16.msra.mxu0 %v4821_v10 }
 0x1f9   : > { %3672 = vmatprep.subr.bf16.mxu1 %v4309_v19  ;;  %3692 = vmatprep.subr.bf16.mxu0 %v4309_v19 }
 0x1fb   : > { %3649 = vmatmul.mubr.msk.bf16.vlgmr.msra.gmra.mrb[16].mxu1 %vm1947_vm7, %v4000_v17  ;;  %3669 = vmatmul.mubr.msk.bf16.vlgmr.msra.gmra.mrb[20].mxu0 %vm1947_vm7, %v4001_v18 }
 0x1fc   : > { %3673 = vmatpush3.bf16.msra.mxu1 %v4746_v43  ;;  %3693 = vmatpush3.bf16.msra.mxu0 %v4746_v43 }
 0x1fd   : > { %3674 = vmatprep.subr.bf16.mxu1 %v4309_v19  ;;  %3694 = vmatprep.subr.bf16.mxu0 %v4309_v19 }
 0x1fe   : > { %3688 = vmatprep.mubr.msk.bf16.mxu1 %vm4310_vm4, %v4309_v19  ;;  %3708 = vmatprep.mubr.msk.bf16.mxu0 %vm4310_vm4, %v4309_v19 }
 0x200   : > { %3675 = vmatpush3.bf16.msra.mxu1 %v4754_v59  ;;  %3695 = vmatpush3.bf16.msra.mxu0 %v4754_v59 }
 0x201   : > { %3676 = vmatprep.subr.bf16.mxu1 %v4309_v19  ;;  %3696 = vmatprep.subr.bf16.mxu0 %v4309_v19 }
 0x204   : > { %3677 = vmatpush3.bf16.msra.mxu1 %v4768_v15  ;;  %3697 = vmatpush3.bf16.msra.mxu0 %v4768_v15 }
 0x205   : > { %3678 = vmatprep.subr.bf16.mxu1 %v4309_v19  ;;  %3698 = vmatprep.subr.bf16.mxu0 %v4309_v19 }
 0x208   : > { %3679 = vmatpush3.bf16.msra.mxu1 %v4780_v23  ;;  %3699 = vmatpush3.bf16.msra.mxu0 %v4780_v23 }
 0x209   : > { %3680 = vmatprep.subr.bf16.mxu1 %v4309_v19  ;;  %3700 = vmatprep.subr.bf16.mxu0 %v4309_v19 }
 0x20c   : > { %3681 = vmatpush3.bf16.msra.mxu1 %v4787_v30  ;;  %3701 = vmatpush3.bf16.msra.mxu0 %v4787_v30 }
 0x20d   : > { %3682 = vmatprep.subr.bf16.mxu1 %v4309_v19  ;;  %3702 = vmatprep.subr.bf16.mxu0 %v4309_v19 }
 0x210   : > { %3683 = vmatpush3.bf16.msra.mxu1 %v4809_v5  ;;  %3703 = vmatpush3.bf16.msra.mxu0 %v4809_v5 }
 0x211   : > { %3684 = vmatprep.subr.bf16.mxu1 %v4309_v19  ;;  %3704 = vmatprep.subr.bf16.mxu0 %v4309_v19 }
 0x214   : > { %3685 = vmatpush3.bf16.msra.mxu1 %v4815_v37  ;;  %3705 = vmatpush3.bf16.msra.mxu0 %v4815_v37 }
 0x215   : > { %3686 = vmatprep.subr.bf16.mxu1 %v4309_v19  ;;  %3706 = vmatprep.subr.bf16.mxu0 %v4309_v19 }
 0x218   : > { %3687 = vmatpush3.bf16.msra.mxu1 %v4821_v10  ;;  %3707 = vmatpush3.bf16.msra.mxu0 %v4821_v10 }
 0x219   : > { %3712 = vmatprep.subr.bf16.mxu1 %v4309_v19  ;;  %3732 = vmatprep.subr.bf16.mxu0 %v4309_v19 }
 0x21b   : > { %3689 = vmatmul.mubr.msk.bf16.vlgmr.msra.gmra.mrb[20].mxu1 %vm1947_vm7, %v2343_v11  ;;  %3709 = vmatmul.mubr.msk.bf16.vlgmr.msra.gmra.mrb[24].mxu0 %vm1947_vm7, %v2399_v20 }
 0x21c   : > { %3713 = vmatpush3.bf16.msra.mxu1 %v4746_v43  ;;  %3733 = vmatpush3.bf16.msra.mxu0 %v4746_v43 }
 0x21d   : > { %3714 = vmatprep.subr.bf16.mxu1 %v4309_v19  ;;  %3734 = vmatprep.subr.bf16.mxu0 %v4309_v19 }
 0x21e   : > { %3728 = vmatprep.mubr.msk.bf16.mxu1 %vm4310_vm4, %v4309_v19  ;;  %3748 = vmatprep.mubr.msk.bf16.mxu0 %vm4310_vm4, %v4309_v19 }
 0x220   : > { %3715 = vmatpush3.bf16.msra.mxu1 %v4754_v59  ;;  %3735 = vmatpush3.bf16.msra.mxu0 %v4754_v59 }
 0x221   : > { %3716 = vmatprep.subr.bf16.mxu1 %v4309_v19  ;;  %3736 = vmatprep.subr.bf16.mxu0 %v4309_v19 }
 0x224   : > { %3717 = vmatpush3.bf16.msra.mxu1 %v4768_v15  ;;  %3737 = vmatpush3.bf16.msra.mxu0 %v4768_v15 }
 0x225   : > { %3718 = vmatprep.subr.bf16.mxu1 %v4309_v19  ;;  %3738 = vmatprep.subr.bf16.mxu0 %v4309_v19 }
 0x228   : > { %3719 = vmatpush3.bf16.msra.mxu1 %v4780_v23  ;;  %3739 = vmatpush3.bf16.msra.mxu0 %v4780_v23 }
 0x229   : > { %3720 = vmatprep.subr.bf16.mxu1 %v4309_v19  ;;  %3740 = vmatprep.subr.bf16.mxu0 %v4309_v19 }
 0x22c   : > { %3721 = vmatpush3.bf16.msra.mxu1 %v4787_v30  ;;  %3741 = vmatpush3.bf16.msra.mxu0 %v4787_v30 }
 0x22d   : > { %3722 = vmatprep.subr.bf16.mxu1 %v4309_v19  ;;  %3742 = vmatprep.subr.bf16.mxu0 %v4309_v19 }
 0x230   : > { %3723 = vmatpush3.bf16.msra.mxu1 %v4809_v5  ;;  %3743 = vmatpush3.bf16.msra.mxu0 %v4809_v5 }
 0x231   : > { %3724 = vmatprep.subr.bf16.mxu1 %v4309_v19  ;;  %3744 = vmatprep.subr.bf16.mxu0 %v4309_v19 }
 0x234   : > { %3725 = vmatpush3.bf16.msra.mxu1 %v4815_v37  ;;  %3745 = vmatpush3.bf16.msra.mxu0 %v4815_v37 }
 0x235   : > { %3726 = vmatprep.subr.bf16.mxu1 %v4309_v19  ;;  %3746 = vmatprep.subr.bf16.mxu0 %v4309_v19 }
 0x238   : > { %3727 = vmatpush3.bf16.msra.mxu1 %v4821_v10  ;;  %3747 = vmatpush3.bf16.msra.mxu0 %v4821_v10 }
 0x239   : > { %3752 = vmatprep.subr.bf16.mxu1 %v4309_v19  ;;  %3772 = vmatprep.subr.bf16.mxu0 %v4309_v19 }
 0x23b   : > { %3729 = vmatmul.mubr.msk.bf16.vlgmr.msra.gmra.mrb[24].mxu1 %vm1947_vm7, %v2457_v22  ;;  %3749 = vmatmul.mubr.msk.bf16.vlgmr.msra.gmra.mrb[28].mxu0 %vm1947_vm7, %v2515_v24 }
 0x23c   : > { %3753 = vmatpush3.bf16.msra.mxu1 %v4746_v43  ;;  %3773 = vmatpush3.bf16.msra.mxu0 %v4746_v43 }
 0x23d   : > { %3754 = vmatprep.subr.bf16.mxu1 %v4309_v19  ;;  %3774 = vmatprep.subr.bf16.mxu0 %v4309_v19 }
 0x23e   : > { %3768 = vmatprep.mubr.msk.bf16.mxu1 %vm4310_vm4, %v4309_v19  ;;  %3788 = vmatprep.mubr.msk.bf16.mxu0 %vm4310_vm4, %v4309_v19 }
 0x240   : > { %3755 = vmatpush3.bf16.msra.mxu1 %v4754_v59  ;;  %3775 = vmatpush3.bf16.msra.mxu0 %v4754_v59 }
 0x241   : > { %3756 = vmatprep.subr.bf16.mxu1 %v4309_v19  ;;  %3776 = vmatprep.subr.bf16.mxu0 %v4309_v19 }
 0x244   : > { %3757 = vmatpush3.bf16.msra.mxu1 %v4768_v15  ;;  %3777 = vmatpush3.bf16.msra.mxu0 %v4768_v15 }
 0x245   : > { %3758 = vmatprep.subr.bf16.mxu1 %v4309_v19  ;;  %3778 = vmatprep.subr.bf16.mxu0 %v4309_v19 }
 0x248   : > { %3759 = vmatpush3.bf16.msra.mxu1 %v4780_v23  ;;  %3779 = vmatpush3.bf16.msra.mxu0 %v4780_v23 }
 0x249   : > { %3760 = vmatprep.subr.bf16.mxu1 %v4309_v19  ;;  %3780 = vmatprep.subr.bf16.mxu0 %v4309_v19 }
 0x24c   : > { %3761 = vmatpush3.bf16.msra.mxu1 %v4787_v30  ;;  %3781 = vmatpush3.bf16.msra.mxu0 %v4787_v30 }
 0x24d   : > { %3762 = vmatprep.subr.bf16.mxu1 %v4309_v19  ;;  %3782 = vmatprep.subr.bf16.mxu0 %v4309_v19 }
 0x250   : > { %3763 = vmatpush3.bf16.msra.mxu1 %v4809_v5  ;;  %3783 = vmatpush3.bf16.msra.mxu0 %v4809_v5 }
 0x251   : > { %3764 = vmatprep.subr.bf16.mxu1 %v4309_v19  ;;  %3784 = vmatprep.subr.bf16.mxu0 %v4309_v19 }
 0x254   : > { %3765 = vmatpush3.bf16.msra.mxu1 %v4815_v37  ;;  %3785 = vmatpush3.bf16.msra.mxu0 %v4815_v37 }
 0x255   : > { %3766 = vmatprep.subr.bf16.mxu1 %v4309_v19  ;;  %3786 = vmatprep.subr.bf16.mxu0 %v4309_v19 }
 0x258   : > { %3767 = vmatpush3.bf16.msra.mxu1 %v4821_v10  ;;  %3787 = vmatpush3.bf16.msra.mxu0 %v4821_v10 }
 0x259   : > { %3792 = vmatprep.subr.bf16.mxu1 %v4309_v19  ;;  %3812 = vmatprep.subr.bf16.mxu0 %v4309_v19 }
 0x25b   : > { %3769 = vmatmul.mubr.msk.bf16.vlgmr.msra.gmra.mrb[28].mxu1 %vm1947_vm7, %v2573_v25  ;;  %3789 = vmatmul.mubr.msk.bf16.vlgmr.msra.gmra.mrb[32].mxu0 %vm1947_vm7, %v2630_v26 }
 0x25c   : > { %3793 = vmatpush3.bf16.msra.mxu1 %v4746_v43  ;;  %3813 = vmatpush3.bf16.msra.mxu0 %v4746_v43  ;;  %v2688_v43 = vld [vmem:[%s5344_s23] sm:$0xf]  ;;  %s5350_s23 = sld [smem:[#allocation40_spill]] }
 0x25d   : > { %3794 = vmatprep.subr.bf16.mxu1 %v4309_v19  ;;  %3814 = vmatprep.subr.bf16.mxu0 %v4309_v19 }
 0x25e   : > { %3808 = vmatprep.mubr.msk.bf16.mxu1 %vm4310_vm4, %v4309_v19  ;;  %3828 = vmatprep.mubr.msk.bf16.mxu0 %vm4310_vm4, %v4309_v19 }
 0x260   : > { %3795 = vmatpush3.bf16.msra.mxu1 %v4754_v59  ;;  %3815 = vmatpush3.bf16.msra.mxu0 %v4754_v59  ;;  %v2746_v59 = vld [vmem:[%s5345_s11] sm:$0xf]  ;;  %s5351_s11 = sld [smem:[#allocation41_spill]] }
 0x261   : > { %3796 = vmatprep.subr.bf16.mxu1 %v4309_v19  ;;  %3816 = vmatprep.subr.bf16.mxu0 %v4309_v19 }
 0x262   : > { %v2266_v0 = vld [vmem:[%s5350_s23] sm:$0xff]  ;;  %v2267_v4 = vld [vmem:[%s5350_s23 + $0x8] sm:$0xff] }
 0x264   : > { %3797 = vmatpush3.bf16.msra.mxu1 %v4768_v15  ;;  %3817 = vmatpush3.bf16.msra.mxu0 %v4768_v15  ;;  %v1946_v15 = vld [vmem:[%s5346_s1] sm:$0xf]  ;;  %s5352_s1 = sld [smem:[#allocation42_spill]] }
 0x265   : > { %3798 = vmatprep.subr.bf16.mxu1 %v4309_v19  ;;  %3818 = vmatprep.subr.bf16.mxu0 %v4309_v19 }
 0x268   : > { %3799 = vmatpush3.bf16.msra.mxu1 %v4780_v23  ;;  %3819 = vmatpush3.bf16.msra.mxu0 %v4780_v23  ;;  %v2015_v23 = vld [vmem:[%s5347_s5] sm:$0xff]  ;;  %s5353_s5 = sld [smem:[#allocation43_spill]] }
 0x269   : > { %3800 = vmatprep.subr.bf16.mxu1 %v4309_v19  ;;  %3820 = vmatprep.subr.bf16.mxu0 %v4309_v19 }
 0x26c   : > { %3801 = vmatpush3.bf16.msra.mxu1 %v4787_v30  ;;  %3821 = vmatpush3.bf16.msra.mxu0 %v4787_v30 }
 0x26d   : > { %3802 = vmatprep.subr.bf16.mxu1 %v4309_v19  ;;  %3822 = vmatprep.subr.bf16.mxu0 %v4309_v19 }
 0x270   : > { %3803 = vmatpush3.bf16.msra.mxu1 %v4809_v5  ;;  %3823 = vmatpush3.bf16.msra.mxu0 %v4809_v5 }
 0x271   : > { %3804 = vmatprep.subr.bf16.mxu1 %v4309_v19  ;;  %3824 = vmatprep.subr.bf16.mxu0 %v4309_v19 }
 0x274   : > { %3805 = vmatpush3.bf16.msra.mxu1 %v4815_v37  ;;  %3825 = vmatpush3.bf16.msra.mxu0 %v4815_v37 }
 0x275   : > { %3806 = vmatprep.subr.bf16.mxu1 %v4309_v19  ;;  %3826 = vmatprep.subr.bf16.mxu0 %v4309_v19 }
 0x278   : > { %3807 = vmatpush3.bf16.msra.mxu1 %v4821_v10  ;;  %3827 = vmatpush3.bf16.msra.mxu0 %v4821_v10 }
 0x27b   : > { %3809 = vmatmul.mubr.msk.bf16.vlgmr.msra.gmra.mrb[32].mxu1 %vm1947_vm7, %v2688_v43  ;;  %3829 = vmatmul.mubr.msk.bf16.vlgmr.msra.gmra.mrb[36].mxu0 %vm1947_vm7, %v2746_v59 }
 0x28e   : > { %v1989_v27 = vpop.f32.mrb[8].mxu1  ;;  %v2053_v28 = vpop.f32.mrb[12].mxu0 }
 0x28f   : > { %v1990_v29 = vadd.f32 %v1989_v27, %v1946_v15  ;;  %v3570_v30 = vpop.f32.mrb[9].mxu1  ;;  %v2054_v31 = vadd.f32 %v2053_v28, %v2015_v23  ;;  %v3590_v32 = vpop.f32.mrb[13].mxu0  ;;  %v2344_v23 = vld [vmem:[%s5351_s11] sm:$0xff]  ;;  %s5355_s11 = sld [smem:[#allocation38_spill]] }
 0x290   : > { %v1992_v33 = vpop.f32.mrb[10].mxu1  ;;  %v2056_v19 = vpop.f32.mrb[14].mxu0  ;;  %v2400_v27 = vld [vmem:[%s5352_s1] sm:$0xff]  ;;  %s5356_s1 = sld [smem:[#allocation45_spill]] }
 0x291   : > { %v3213_v34 = vmul.f32 -1.442695, %v1990_v29  ;;  %v3215_v36 = vmul.f32 -1.442695, %v2054_v31  ;;  %v3571_v38 = vpop.f32.mrb[11].mxu1  ;;  %v3591_v39 = vpop.f32.mrb[15].mxu0 }
 0x293   : > { %4002 = vpow2.f32 %v3213_v34 }
 0x294   : > { %4004 = vpow2.f32 %v3215_v36 }
 0x29d   : > { %v4003_v40 = vpop.eup %4002 }
 0x29e   : > { %v4005_v41 = vpop.eup %4004  ;;  %v1998_v42 = vadd.f32 1.0, %v4003_v40 }
 0x29f   : > { %v2062_v44 = vadd.f32 1.0, %v4005_v41 }
 0x2a0   : > { %4006 = vrcp.f32 %v1998_v42 }
 0x2a1   : > { %4008 = vrcp.f32 %v2062_v44 }
 0x2aa   : > { %v4007_v45 = vpop.eup %4006 }
 0x2ab   : > { %2003 = vperm.xlu0 %3997, %v4007_v45   ;;  %v4009_v46 = vpop.eup %4008 }
 0x2ae   : > { %v2113_v48 = vpop.f32.mrb[12].mxu1  ;;  %v5072_v49 = vpop.f32.mrb[16].mxu0 }
 0x2af   : > { %v2114_v50 = vadd.f32 %v2113_v48, %v2075_v47  ;;  %v3610_v52 = vpop.f32.mrb[13].mxu1  ;;  %2067 = vperm.xlu0 %3997, %v4009_v46   ;;  %v3630_v53 = vpop.f32.mrb[17].mxu0 }
 0x2b0   : > { %v2116_v54 = vpop.f32.mrb[14].mxu1  ;;  %v2172_v55 = vpop.f32.mrb[18].mxu0  ;;  %v2516_v52 = vld [vmem:[%s5354_s28] sm:$0xff]  ;;  %s5084_s28 = sand.u32 1, %s4259_s16  }
 0x2b1   : > { %v3217_v56 = vmul.f32 -1.442695, %v2114_v50  ;;  %v3611_v57 = vpop.f32.mrb[15].mxu1  ;;  %v3631_v58 = vpop.f32.mrb[19].mxu0  ;;  %v2458_v50 = vld [vmem:[%s5353_s5] sm:$0xff]  ;;  %s5357_s5 = sld [smem:[#allocation46_spill]] }
 0x2b2   : > { %s5088_s3 = sshll.u32 %s5084_s28, 3  ;;  %s3182_s6 = sshll.u32 %s5084_s28, 4 }
 0x2b3   : > { %4010 = vpow2.f32 %v3217_v56  ;;  %s5283_s8 = scalar_lea.vmem [#allocation6], %s5088_s3 }
 0x2bd   : > { %v4011_v60 = vpop.eup %4010 }
 0x2be   : > { %v2122_v61 = vadd.f32 1.0, %v4011_v60 }
 0x2c0   : > { %4012 = vrcp.f32 %v2122_v61 }
 0x2ca   : > { %v4013_v62 = vpop.eup %4012 }
 0x2cb   : > { %2127 = vperm.xlu1 %3998, %v4013_v62  }
 0x2ce   : > { %v2235_v1 = vpop.f32.mrb[16].mxu1  ;;  %v2310_v3 = vpop.f32.mrb[20].mxu0 }
 0x2cf   : > { %v2236_v35 = vadd.f32 %v2235_v1, %v2191_v63  ;;  %v3650_v5 = vpop.f32.mrb[17].mxu1  ;;  %v2311_v6 = vadd.f32 %v2310_v3, %v2266_v0  ;;  %v3670_v7 = vpop.f32.mrb[21].mxu0 }
 0x2d0   : > { %v2238_v8 = vpop.f32.mrb[18].mxu1  ;;  %v2313_v9 = vpop.f32.mrb[22].mxu0  ;;  %v4312_v5 = vmov 839922192   ;;  %v2008_v7 = vlaneseq }
 0x2d1   : > { %v3222_v37 = vmul.f32 -1.442695, %v2236_v35  ;;  %v2239_v51 = vadd.f32 %v2238_v8, %v2192_v2  ;;  %v3226_v10 = vmul.f32 -1.442695, %v2311_v6  ;;  %v3651_v12 = vpop.f32.mrb[19].mxu1  ;;  %v2314_v13 = vadd.f32 %v2313_v9, %v2267_v4  ;;  %v3671_v14 = vpop.f32.mrb[23].mxu0 }
 0x2d2   : > { %v2006_v6 = vunpack.c.l.s4 %v4312_v5  ;;  %v2009_v9 = vshrl.u32 %v2008_v7, 7 }
 0x2d3   : > { %4014 = vpow2.f32 %v3222_v37  ;;  %v3223_v16 = vmul.f32 -1.442695, %v2239_v51  ;;  %v3227_v17 = vmul.f32 -1.442695, %v2314_v13  ;;  %v2131_v37 = vld [vmem:[%s5355_s11] sm:$0xff]  ;;  %s5099_s11 = scalar_lea.vmem [#allocation7], %s3182_s6 }
 0x2d4   : > { %4016 = vpow2.f32 %v3226_v10  ;;  %v2007_v8 = vunpack.c.0.s8 %v2006_v6  ;;  %v2170_v12 = vadd.f32 %v5072_v49, %v2131_v37  ;;  %s2854_s14 = sshll.u32 %s5099_s11, 4  ;;  %s5125_s14 = int_to_ptr.vmem [resolvable:$true] %s2854_s14 }
 0x2d5   : > { %4018 = vpow2.f32 %v3223_v16  ;;  %s4081_s19 = scalar_lea.vmem %s5125_s14, 256 }
 0x2d6   : > { %4020 = vpow2.f32 %v3227_v17  ;;  %v2010_v51 = vsub.s32 %v2007_v8, %v2009_v9  ;;  %v2574_v17 = vld [vmem:[%s5356_s1] sm:$0xff]  ;;  %s5358_s1 = sld [smem:[#allocation47_spill]]  ;;  %p4082_p5 = scmp.ne.s32.totalorder %s5125_s14, %s4081_s19 }
 0x2d8   : > { %p4083_p8 = pnand %p4082_p5, %p5360_p6 }
 0x2da   : > { %p4084_p9 = pneg %p4083_p8 }
 0x2dd   : > { %v4015_v18 = vpop.eup %4014 }
 0x2de   : > { %v4017_v11 = vpop.eup %4016  ;;  %v2248_v20 = vadd.f32 1.0, %v4015_v18  ;;  %v2631_v18 = vld [vmem:[%s5357_s5] sm:$0xff]  ;;  %s5359_s5 = sld [smem:[#allocation48_spill]] }
 0x2df   : > { %v4019_v21 = vpop.eup %4018  ;;  %v2323_v22 = vadd.f32 1.0, %v4017_v11  ;;  %v3219_v11 = vmul.f32 -1.442695, %v2170_v12 }
 0x2e0   : > { %v4021_v24 = vpop.eup %4020  ;;  %4022 = vrcp.f32 %v2248_v20  ;;  %v2249_v25 = vadd.f32 1.0, %v4019_v21 }
 0x2e1   : > { %4024 = vrcp.f32 %v2323_v22  ;;  %v2324_v26 = vadd.f32 1.0, %v4021_v24 }
 0x2e2   : > { %4026 = vrcp.f32 %v2249_v25 }
 0x2e3   : > { %4028 = vrcp.f32 %v2324_v26 }
 0x2ea   : > { %v4023_v43 = vpop.eup %4022 }
 0x2eb   : > { %v4025_v59 = vpop.eup %4024  ;;  %2256 = vperm.xlu1 %3998, %v4023_v43  }
 0x2ec   : > { %v4027_v15 = vpop.eup %4026 }
 0x2ed   : > { %2261 = vperm.xlu0 %3997, %v4027_v15   ;;  %v4029_v28 = vpop.eup %4028 }
 0x2ee   : > { %v2382_v29 = vpop.f32.mrb[20].mxu1  ;;  %v2438_v30 = vpop.f32.mrb[24].mxu0 }
 0x2ef   : > { %v2383_v31 = vadd.f32 %v2382_v29, %v2344_v23  ;;  %2331 = vperm.xlu1 %3998, %v4025_v59   ;;  %v3690_v32 = vpop.f32.mrb[21].mxu1  ;;  %v2439_v33 = vadd.f32 %v2438_v30, %v2400_v27  ;;  %v3710_v19 = vpop.f32.mrb[25].mxu0 }
 0x2f0   : > { %v2385_v34 = vpop.f32.mrb[22].mxu1  ;;  %v2441_v36 = vpop.f32.mrb[26].mxu0 }
 0x2f1   : > { %v3229_v38 = vmul.f32 -1.442695, %v2383_v31  ;;  %v3231_v39 = vmul.f32 -1.442695, %v2439_v33  ;;  %2336 = vperm.xlu0 %3997, %v4029_v28   ;;  %v3691_v40 = vpop.f32.mrb[23].mxu1  ;;  %v3711_v41 = vpop.f32.mrb[27].mxu0 }
 0x2f3   : > { %4030 = vpow2.f32 %v3229_v38  ;;  %v2689_v38 = vld [vmem:[%s5358_s1] sm:$0xff]  ;;  %s1249_s1 = scalar_lea.vmem [#allocation10], %s3182_s6  ;;  %s5128_s6 = scalar_lea.hbm %s5324_s4, %s3265_s9 }
 0x2f4   : > { %4032 = vpow2.f32 %v3231_v39  ;;  %v2747_v39 = vld [vmem:[%s5359_s5] sm:$0xff]  ;;  %s2880_s5 = sshll.u32 %s1249_s1, 4  ;;  %s5116_s5 = int_to_ptr.vmem [resolvable:$true] %s2880_s5 }
 0x2fd   : > { %v4031_v42 = vpop.eup %4030 }
 0x2fe   : > { %v4033_v44 = vpop.eup %4032  ;;  %v2391_v45 = vadd.f32 1.0, %v4031_v42 }
 0x2ff   : > { %v2447_v46 = vadd.f32 1.0, %v4033_v44 }
 0x300   : > { %4034 = vrcp.f32 %v2391_v45 }
 0x301   : > { %4036 = vrcp.f32 %v2447_v46 }
 0x30a   : > { %v4035_v47 = vpop.eup %4034 }
 0x30b   : > { %2396 = vperm.xlu0 %3997, %v4035_v47   ;;  %v4037_v48 = vpop.eup %4036 }
 0x30e   : > { %v2496_v53 = vpop.f32.mrb[24].mxu1  ;;  %v2554_v54 = vpop.f32.mrb[28].mxu0 }
 0x30f   : > { %v2497_v55 = vadd.f32 %v2496_v53, %v2458_v50  ;;  %2452 = vperm.xlu0 %3997, %v4037_v48   ;;  %v3730_v56 = vpop.f32.mrb[25].mxu1  ;;  %v2555_v57 = vadd.f32 %v2554_v54, %v2516_v52  ;;  %v3750_v58 = vpop.f32.mrb[29].mxu0 }
 0x310   : > { %v2499_v60 = vpop.f32.mrb[26].mxu1  ;;  %v2557_v61 = vpop.f32.mrb[30].mxu0 }
 0x311   : > { %v3233_v62 = vmul.f32 -1.442695, %v2497_v55  ;;  %v3235_v63 = vmul.f32 -1.442695, %v2555_v57  ;;  %v3731_v0 = vpop.f32.mrb[27].mxu1  ;;  %v3751_v1 = vpop.f32.mrb[31].mxu0 }
 0x313   : > { %4038 = vpow2.f32 %v3233_v62  ;;  %v5108_v62 = vand.u32 127, %v2008_v7 }
 0x314   : > { %4040 = vpow2.f32 %v3235_v63 }
 0x315   : > { %vm2186_vm8 = vcmp.ge.s32.totalorder %v5108_v62, 64 }
 0x31d   : > { %v4039_v2 = vpop.eup %4038 }
 0x31e   : > { %v4041_v3 = vpop.eup %4040  ;;  %v2505_v4 = vadd.f32 1.0, %v4039_v2 }
 0x31f   : > { %v2563_v35 = vadd.f32 1.0, %v4041_v3 }
 0x320   : > { %4042 = vrcp.f32 %v2505_v4 }
 0x321   : > { %4044 = vrcp.f32 %v2563_v35 }
 0x322   : > { %4046 = vpow2.f32 %v3219_v11 }
 0x32a   : > { %v4043_v10 = vpop.eup %4042  ;;  %v2004_v13 = vpop.permute.xlu0 %2003 }
 0x32b   : > { %v2011_v14 = vrot.slane %v2004_v13, %v2010_v51  ;;  %2510 = vperm.xlu1 %3998, %v4043_v10   ;;  %v4045_v16 = vpop.eup %4044 }
 0x32c   : > { %v4047_v29 = vpop.eup %4046 }
 0x32d   : > { %2013 = vst [vmem:[%s5283_s8] sm:$0xff] %v2011_v14  ;;  %v2178_v19 = vadd.f32 1.0, %v4047_v29  ;;  %s2810_s8 = sand.u32 1, %s4541_s0  }
 0x32e   : > { %v2612_v20 = vpop.f32.mrb[28].mxu1  ;;  %v2669_v21 = vpop.f32.mrb[32].mxu0  ;;  %s5132_s17 = scalar_lea.sflag [#allocation8], %s2810_s8 }
 0x32f   : > { %v2613_v22 = vadd.f32 %v2612_v20, %v2574_v17  ;;  %v2670_v24 = vadd.f32 %v2669_v21, %v2631_v18  ;;  %v2068_v25 = vpop.permute.xlu0 %2067  ;;  %2568 = vperm.xlu1 %3998, %v4045_v16   ;;  %v3770_v26 = vpop.f32.mrb[29].mxu1 }
 0x330   : > { %2070 = vst [vmem:[%s5099_s11] sm:$0xff] %v2068_v25  ;;  %2071 = vst [vmem:[%s5099_s11 + $0x8] sm:$0xff] %v2068_v25  ;;  %v2615_v49 = vpop.f32.mrb[30].mxu1  ;;  %v3790_v43 = vpop.f32.mrb[33].mxu0 }
 0x331   : > { %v3237_v59 = vmul.f32 -1.442695, %v2613_v22  ;;  %v3239_v15 = vmul.f32 -1.442695, %v2670_v24  ;;  %v3771_v23 = vpop.f32.mrb[31].mxu1  ;;  %v2672_v27 = vpop.f32.mrb[34].mxu0 }
 0x332   : > { %v3791_v28 = vpop.f32.mrb[35].mxu0 }
 0x333   : > { %4048 = vpow2.f32 %v3237_v59 }
 0x334   : > { %4050 = vpow2.f32 %v3239_v15 }
 0x33d   : > { %v4049_v30 = vpop.eup %4048 }
 0x33e   : > { %v4051_v31 = vpop.eup %4050  ;;  %v2621_v32 = vadd.f32 1.0, %v4049_v30 }
 0x33f   : > { %v2678_v33 = vadd.f32 1.0, %v4051_v31 }
 0x340   : > { %4052 = vrcp.f32 %v2621_v32 }
 0x341   : > { %4054 = vrcp.f32 %v2678_v33 }
 0x342   : > { %4056 = vrcp.f32 %v2178_v19 }
 0x34a   : > { %v4053_v34 = vpop.eup %4052  ;;  %v5105_v61 = vpop.permute.xlu1 %2127 }
 0x34b   : > { %v4055_v36 = vpop.eup %4054  ;;  %2626 = vperm.xlu0 %3997, %v4053_v34  }
 0x34c   : > { %2683 = vperm.xlu1 %3998, %v4055_v36   ;;  %v4057_v40 = vpop.eup %4056 }
 0x34e   : > { %v2727_v41 = vpop.f32.mrb[32].mxu1  ;;  %v2785_v42 = vpop.f32.mrb[36].mxu0 }
 0x34f   : > { %v2728_v44 = vadd.f32 %v2727_v41, %v2689_v38  ;;  %v2786_v45 = vadd.f32 %v2785_v42, %v2747_v39  ;;  %2183 = vperm.xlu0 %3997, %v4057_v40   ;;  %v3810_v46 = vpop.f32.mrb[33].mxu1  ;;  %v3830_v47 = vpop.f32.mrb[37].mxu0 }
 0x350   : > { %v2730_v48 = vpop.f32.mrb[34].mxu1  ;;  %v2788_v50 = vpop.f32.mrb[38].mxu0 }
 0x351   : > { %v3241_v52 = vmul.f32 -1.442695, %v2728_v44  ;;  %v3243_v53 = vmul.f32 -1.442695, %v2786_v45  ;;  %v3811_v54 = vpop.f32.mrb[35].mxu1  ;;  %v3831_v55 = vpop.f32.mrb[39].mxu0 }
 0x353   : > { %4058 = vpow2.f32 %v3241_v52 }
 0x354   : > { %4060 = vpow2.f32 %v3243_v53 }
 0x35d   : > { %v4059_v56 = vpop.eup %4058 }
 0x35e   : > { %v4061_v57 = vpop.eup %4060  ;;  %v2736_v58 = vadd.f32 1.0, %v4059_v56 }
 0x35f   : > { %v2794_v60 = vadd.f32 1.0, %v4061_v57 }
 0x360   : > { %4062 = vrcp.f32 %v2736_v58 }
 0x361   : > { %4064 = vrcp.f32 %v2794_v60 }
 0x36a   : > { %v4063_v63 = vpop.eup %4062  ;;  %v2257_v0 = vpop.permute.xlu1 %2256 }
 0x36b   : > { %2741 = vperm.xlu1 %3998, %v4063_v63   ;;  %v4065_v1 = vpop.eup %4064 }
 0x36c   : > { %v2262_v2 = vpop.permute.xlu0 %2261 }
 0x36e   : > { %v2332_v3 = vpop.permute.xlu1 %2331 }
 0x36f   : > { %v2339_v4 = vsel %vm2186_vm8, %v2332_v3, %v2257_v0  ;;  %2799 = vperm.xlu1 %3998, %v4065_v1  }
 0x370   : > { %2341 = vst [vmem:[%s1249_s1] sm:$0xff] %v2339_v4  ;;  %v2337_v35 = vpop.permute.xlu0 %2336 }
 0x371   : > { %v2340_v5 = vsel %vm2186_vm8, %v2337_v35, %v2262_v2 }
 0x372   : > { %2342 = vst [vmem:[%s1249_s1 + $0x8] sm:$0xff] %v2340_v5  ;;  %s4313_s1 = smov [#allocation7]  }
 0x373   : > { %s4085_s21 = sshll.u32 %s4313_s1, 4  ;;  %s4086_s21 = int_to_ptr.vmem [resolvable:$false] %s4085_s21 }
 0x374   : > { %s4087_s23 = scalar_lea.vmem %s4086_s21, 512  ;;  %p4088_p10 = scmp.lt.s32.totalorder %s5125_s14, %s4086_s21 }
 0x375   : > { %p4089_p11 = scmp.lt.s32.totalorder %s4087_s23, %s4081_s19 }
 0x377   : > { %p4090_p12 = por %p4089_p11, %p4088_p10 }
 0x379   : > { %p4091_p13 = pnand %p4090_p12, %p4084_p9 }
 0x37b   : > { %4094 = shalt.err (!%p4091_p13)
}
 0x37c   : > { %s4095_s9 = scalar_lea.hbm %s5122_s13, 256  ;;  %s4099_s11 = scalar_lea.hbm %s5323_s20, 512 }
 0x37d   : > { %p4096_p0 = scmp.ne.s32.totalorder %s5122_s13, %s4095_s9  ;;  %p4100_p3 = scmp.lt.u32.totalorder %s5122_s13, %s5323_s20 }
 0x37e   : > { %p4101_p4 = scmp.lt.u32.totalorder %s4099_s11, %s4095_s9  ;;  %p4103_p5 = scmp.lt.u32.totalorder %s4095_s9, %s5122_s13 }
 0x37f   : > { %p4097_p1 = pnand %p4096_p0, %p5360_p6 }
 0x380   : > { %p4102_p7 = por %p4101_p4, %p4100_p3 }
 0x381   : > { %p4098_p2 = pneg %p4097_p1 }
 0x382   : > { %p4104_p8 = por %p4103_p5, %p4102_p7 }
 0x384   : > { %p4105_p9 = pnand %p4104_p8, %p4098_p2 }
 0x386   : > { %4108 = shalt.err (!%p4105_p9)
}
 0x387   : > { %3887 = dma.vmem_to_hbm [thread:$0]  (%p5360_p6), %s5125_s14, 256, %s5122_s13, %s5132_s17  }
 0x388   : > { %s5154_s21 = scalar_lea.sflag [#allocation11], %s2810_s8  ;;  %s4109_s19 = scalar_lea.vmem %s5116_s5, 256 }
 0x389   : > { %p4110_p10 = scmp.ne.s32.totalorder %s5116_s5, %s4109_s19  ;;  %s4314_s23 = smov [#allocation10]  }
 0x38a   : > { %s4113_s1 = sshll.u32 %s4314_s23, 4  ;;  %s4114_s1 = int_to_ptr.vmem [resolvable:$false] %s4113_s1 }
 0x38b   : > { %p4111_p11 = pnand %p4110_p10, %p5360_p6  ;;  %s4115_s9 = scalar_lea.vmem %s4114_s1, 512 }
 0x38c   : > { %p4116_p13 = scmp.lt.s32.totalorder %s5116_s5, %s4114_s1  ;;  %p4117_p0 = scmp.lt.s32.totalorder %s4115_s9, %s4109_s19 }
 0x38d   : > { %p4112_p12 = pneg %p4111_p11 }
 0x38e   : > { %p4118_p1 = por %p4117_p0, %p4116_p13 }
 0x390   : > { %p4119_p2 = pnand %p4118_p1, %p4112_p12 }
 0x392   : > { %4122 = shalt.err (!%p4119_p2)
}
 0x393   : > { %s4123_s13 = scalar_lea.hbm %s5128_s6, 256  ;;  %s4127_s8 = scalar_lea.hbm %s5324_s4, 512 }
 0x394   : > { %p4124_p3 = scmp.ne.s32.totalorder %s5128_s6, %s4123_s13  ;;  %p4128_p5 = scmp.lt.u32.totalorder %s5128_s6, %s5324_s4 }
 0x395   : > { %p4129_p8 = scmp.lt.u32.totalorder %s4127_s8, %s4123_s13  ;;  %p4131_p10 = scmp.lt.u32.totalorder %s4123_s13, %s5128_s6 }
 0x396   : > { %p4125_p4 = pnand %p4124_p3, %p5360_p6 }
 0x397   : > { %p4130_p9 = por %p4129_p8, %p4128_p5 }
 0x398   : > { %p4126_p7 = pneg %p4125_p4 }
 0x399   : > { %p4132_p11 = por %p4131_p10, %p4130_p9 }
 0x39b   : > { %p4133_p12 = pnand %p4132_p11, %p4126_p7 }
 0x39d   : > { %4136 = shalt.err (!%p4133_p12)
}
 0x39e   : > { %s4315_s14 = smov 128   ;;  %s5361_s11 = sld [smem:[#allocation49_spill]] }
 0x39f   : > { %s4316_s19 = smov 8   ;;  %s5175_s23 = sshll.u32 %s4541_s0, 7 }
 0x3a0   : > { %3889 = dma.vmem_to_hbm [thread:$0]  (%p5360_p6), %s5116_s5, 256, %s5128_s6, %s5154_s21, %s4315_s14, %s4315_s14, %s4316_s19  }
 0x3a1   : > { %s5362_s9 = scalar_lea.vmem [#allocation6], %s5088_s3  ;;  %s2806_s8 = scalar_lea.sflag [#allocation4], %s5084_s28 }
 0x3a2   : > { %s2840_s13 = sshll.u32 %s5362_s9, 4  ;;  %s4317_s20 = smov [#allocation6]   ;;  %s2841_s13 = int_to_ptr.vmem [resolvable:$true] %s2840_s13 }
 0x3a3   : > { %s4137_s4 = scalar_lea.vmem %s2841_s13, 128  ;;  %s4141_s24 = sshll.u32 %s4317_s20, 4  ;;  %s4142_s24 = int_to_ptr.vmem [resolvable:$false] %s4141_s24 }
 0x3a4   : > { %s5179_s1 = scalar_lea.hbm %s5361_s11, %s5175_s23  ;;  %p4138_p13 = scmp.ne.s32.totalorder %s2841_s13, %s4137_s4 }
 0x3a5   : > { %s4143_s25 = scalar_lea.vmem %s4142_s24, 256  ;;  %p4144_p2 = scmp.lt.s32.totalorder %s2841_s13, %s4142_s24 }
 0x3a6   : > { %p4139_p0 = pnand %p4138_p13, %p5360_p6  ;;  %p4145_p3 = scmp.lt.s32.totalorder %s4143_s25, %s4137_s4 }
 0x3a8   : > { %p4140_p1 = pneg %p4139_p0  ;;  %p4146_p4 = por %p4145_p3, %p4144_p2 }
 0x3aa   : > { %p4147_p7 = pnand %p4146_p4, %p4140_p1 }
 0x3ac   : > { %4150 = shalt.err (!%p4147_p7)
}
 0x3ad   : > { %s4151_s0 = scalar_lea.hbm %s5179_s1, 128  ;;  %s4155_s20 = scalar_lea.hbm %s5361_s11, 256 }
 0x3ae   : > { %p4152_p5 = scmp.ne.s32.totalorder %s5179_s1, %s4151_s0  ;;  %p4156_p10 = scmp.lt.u32.totalorder %s5179_s1, %s5361_s11 }
 0x3af   : > { %p4157_p11 = scmp.lt.u32.totalorder %s4155_s20, %s4151_s0  ;;  %p4159_p13 = scmp.lt.u32.totalorder %s4151_s0, %s5179_s1 }
 0x3b0   : > { %p4153_p8 = pnand %p4152_p5, %p5360_p6 }
 0x3b1   : > { %p4158_p12 = por %p4157_p11, %p4156_p10 }
 0x3b2   : > { %p4154_p9 = pneg %p4153_p8 }
 0x3b3   : > { %p4160_p0 = por %p4159_p13, %p4158_p12 }
 0x3b5   : > { %p4161_p1 = pnand %p4160_p0, %p4154_p9 }
 0x3b7   : > { %4164 = shalt.err (!%p4161_p1)
}
 0x3b8   : > { %3886 = dma.vmem_to_hbm [thread:$0]  (%p5360_p6), %s2841_s13, 128, %s5179_s1, %s2806_s8   ;;  %v2397_v6 = vpop.permute.xlu0 %2396 }
 0x3b9   : > { %s1242_s25 = scalar_lea.vmem [#allocation9], %s5088_s3  ;;  %s5202_s4 = scalar_lea.hbm %s4508_s27, %s5175_s23 }
 0x3ba   : > { %s2867_s24 = sshll.u32 %s1242_s25, 4  ;;  %s4318_s5 = smov [#allocation9]   ;;  %s5198_s24 = int_to_ptr.vmem [resolvable:$true] %s2867_s24 }
 0x3bb   : > { %s4165_s28 = scalar_lea.vmem %s5198_s24, 128  ;;  %s4169_s6 = sshll.u32 %s4318_s5, 4  ;;  %s4170_s6 = int_to_ptr.vmem [resolvable:$false] %s4169_s6 }
 0x3bc   : > { %v2453_v7 = vpop.permute.xlu0 %2452  ;;  %p4166_p2 = scmp.ne.s32.totalorder %s5198_s24, %s4165_s28  ;;  %s4171_s14 = scalar_lea.vmem %s4170_s6, 256 }
 0x3bd   : > { %p4172_p7 = scmp.lt.s32.totalorder %s5198_s24, %s4170_s6  ;;  %p4173_p5 = scmp.lt.s32.totalorder %s4171_s14, %s4165_s28 }
 0x3be   : > { %p4167_p3 = pnand %p4166_p2, %p5360_p6 }
 0x3bf   : > { %p4174_p8 = por %p4173_p5, %p4172_p7 }
 0x3c0   : > { %p4168_p4 = pneg %p4167_p3 }
 0x3c2   : > { %p4175_p9 = pnand %p4174_p8, %p4168_p4 }
 0x3ca   : > { %v2627_v8 = vpop.permute.xlu0 %2626 }
 0x3ce   : > { %v2184_v9 = vpop.permute.xlu0 %2183 }
 0x3cf   : > { %v2187_v37 = vsel %vm2186_vm8, %v2184_v9, %v5105_v61 }
 0x3d0   : > { %2188 = vst [vmem:[%s1242_s25] sm:$0xff] %v2187_v37 }
 0x3d1   : > { %4178 = shalt.err (!%p4175_p9)
}
 0x3d2   : > { %s4179_s19 = scalar_lea.hbm %s5202_s4, 128  ;;  %s4183_s1 = scalar_lea.hbm %s4508_s27, 256 }
 0x3d3   : > { %p4180_p10 = scmp.ne.s32.totalorder %s5202_s4, %s4179_s19  ;;  %p4184_p13 = scmp.lt.u32.totalorder %s5202_s4, %s4508_s27 }
 0x3d4   : > { %p4185_p0 = scmp.lt.u32.totalorder %s4183_s1, %s4179_s19  ;;  %p4187_p2 = scmp.lt.u32.totalorder %s4179_s19, %s5202_s4 }
 0x3d5   : > { %p4181_p11 = pnand %p4180_p10, %p5360_p6 }
 0x3d6   : > { %p4186_p1 = por %p4185_p0, %p4184_p13 }
 0x3d7   : > { %p4182_p12 = pneg %p4181_p11 }
 0x3d8   : > { %p4188_p3 = por %p4187_p2, %p4186_p1 }
 0x3da   : > { %p4189_p4 = pnand %p4188_p3, %p4182_p12 }
 0x3dc   : > { %4192 = shalt.err (!%p4189_p4)
}
 0x3dd   : > { %3888 = dma.vmem_to_hbm [thread:$0]  (%p5360_p6), %s5198_s24, 128, %s5202_s4, %s5132_s17   ;;  %v2511_v51 = vpop.permute.xlu1 %2510  ;;  %vm2455_vm9 = vcmp.ge.s32.totalorder %v5108_v62, 16  ;;  %vm2513_vm10 = vcmp.ge.s32.totalorder %v5108_v62, 32  ;;  %vm2571_vm11 = vcmp.ge.s32.totalorder %v5108_v62, 48  ;;  %vm2686_vm12 = vcmp.ge.s32.totalorder %v5108_v62, 80 }
 0x3de   : > { %v2456_v13 = vsel %vm2455_vm9, %v2453_v7, %v2397_v6  ;;  %vm2744_vm13 = vcmp.ge.s32.totalorder %v5108_v62, 96  ;;  %s1256_s17 = scalar_lea.vmem [#allocation12], %s5088_s3  ;;  %vm2802_vm14 = vcmp.ge.s32.totalorder %v5108_v62, 112  ;;  %s5238_s13 = scalar_lea.hbm %s4518_s12, %s5175_s23 }
 0x3df   : > { %v2514_v14 = vsel %vm2513_vm10, %v2511_v51, %v2456_v13  ;;  %s2896_s9 = sshll.u32 %s1256_s17, 4  ;;  %s4319_s3 = smov [#allocation12]   ;;  %s5234_s9 = int_to_ptr.vmem [resolvable:$true] %s2896_s9 }
 0x3e0   : > { %s4193_s8 = scalar_lea.vmem %s5234_s9, 128  ;;  %s4197_s0 = sshll.u32 %s4319_s3, 4  ;;  %s4198_s0 = int_to_ptr.vmem [resolvable:$false] %s4197_s0 }
 0x3e1   : > { %v2569_v10 = vpop.permute.xlu1 %2568  ;;  %p4194_p7 = scmp.ne.s32.totalorder %s5234_s9, %s4193_s8  ;;  %s4199_s20 = scalar_lea.vmem %s4198_s0, 256 }
 0x3e2   : > { %v2572_v16 = vsel %vm2571_vm11, %v2569_v10, %v2514_v14  ;;  %p4200_p9 = scmp.lt.s32.totalorder %s5234_s9, %s4198_s0  ;;  %p4201_p10 = scmp.lt.s32.totalorder %s4199_s20, %s4193_s8 }
 0x3e3   : > { %v2629_v17 = vsel %vm2186_vm8, %v2627_v8, %v2572_v16  ;;  %p4195_p5 = pnand %p4194_p7, %p5360_p6 }
 0x3e4   : > { %p4202_p11 = por %p4201_p10, %p4200_p9 }
 0x3e5   : > { %v2684_v12 = vpop.permute.xlu1 %2683  ;;  %p4196_p8 = pneg %p4195_p5 }
 0x3e6   : > { %v2687_v11 = vsel %vm2686_vm12, %v2684_v12, %v2629_v17 }
 0x3e7   : > { %p4203_p12 = pnand %p4202_p11, %p4196_p8 }
 0x3ea   : > { %v2742_v18 = vpop.permute.xlu1 %2741 }
 0x3eb   : > { %v2745_v20 = vsel %vm2744_vm13, %v2742_v18, %v2687_v11 }
 0x3ee   : > { %v2800_v21 = vpop.permute.xlu1 %2799 }
 0x3ef   : > { %v2803_v22 = vsel %vm2802_vm14, %v2800_v21, %v2745_v20 }
 0x3f0   : > { %2804 = vst [vmem:[%s1256_s17] sm:$0xff] %v2803_v22 }
 0x3f1   : > { %4206 = shalt.err (!%p4203_p12)
}
 0x3f2   : > { %s4207_s23 = scalar_lea.hbm %s5238_s13, 128  ;;  %s4211_s25 = scalar_lea.hbm %s4518_s12, 256 }
 0x3f3   : > { %p4208_p13 = scmp.ne.s32.totalorder %s5238_s13, %s4207_s23  ;;  %p4212_p2 = scmp.lt.u32.totalorder %s5238_s13, %s4518_s12 }
 0x3f4   : > { %p4213_p3 = scmp.lt.u32.totalorder %s4211_s25, %s4207_s23  ;;  %p4215_p7 = scmp.lt.u32.totalorder %s4207_s23, %s5238_s13 }
 0x3f5   : > { %p4209_p0 = pnand %p4208_p13, %p5360_p6 }
 0x3f6   : > { %p4214_p4 = por %p4213_p3, %p4212_p2 }
 0x3f7   : > { %p4210_p1 = pneg %p4209_p0 }
 0x3f8   : > { %p4216_p5 = por %p4215_p7, %p4214_p4 }
 0x3fa   : > { %p4217_p8 = pnand %p4216_p5, %p4210_p1 }
 0x3fc   : > { %4220 = shalt.err (!%p4217_p8)
}
 0x3fd   : > { %3890 = dma.vmem_to_hbm [thread:$0]  (%p5360_p6), %s5234_s9, 128, %s5238_s13, %s5154_s21  }
 0x3fe PF: > { %p3918_p9 = scmp.ge.s32.totalorder %s4267_s22, 2  ;;  %s2908_s24 = sand.u32 1, %s4255_s15  }
 0x3ff   : > { %p5363_p10 = scmp.ne.s32.totalorder %s5327_s10, 0  ;;  %s2909_s4 = scalar_lea.sflag [#allocation4], %s2908_s24 }
 0x401   : > { %p3901_p11 = pnand %p3918_p9, %p5363_p10 }
 0x403   : > { %4242 = dma.done.wait (!%p3901_p11), %s2909_s4, 128  }
 0x404   : > { %4244 = vsyncadd (!%p3901_p11), %s2909_s4, 4294967168  ;;  %s5364_s28 = sadd.s32 4294967294, %s4267_s22  }
 0x405   : > { %s2917_s5 = sand.u32 1, %s5364_s28  }
 0x406   : > { %s2918_s6 = scalar_lea.sflag [#allocation8], %s2917_s5 }
 0x407   : > { %4246 = dma.done.wait (!%p3901_p11), %s2918_s6, 384  }
 0x408   : > { %4248 = vsyncadd (!%p3901_p11), %s2918_s6, 4294966912  ;;  %s2936_s7 = scalar_lea.sflag [#allocation11], %s2917_s5 }
 0x409   : > { %4250 = dma.done.wait (!%p3901_p11), %s2936_s7, 384  }
 0x40a   : > { %4252 = vsyncadd (!%p3901_p11), %s2936_s7, 4294966912  ;;  %p95_p6 = scmp.ge.s32.totalorder %s4545_s26, 4   ;;  %s5365_s15 = smov %s4259_s16 }
 0x40b   : > { %s5366_s16 = smov %s4263_s18  ;;  %s5367_s18 = smov %s4558_s2 }
 0x40c   : > { %s5368_s22 = smov %s4545_s26  ;;  %97 = sbr.rel (!%p95_p6) target bundleno = 94 (0x5e), region = 310 }
 0x413   :  { %2950 = vsyncpa [#allocation4], 1 }
 0x414   :  { %2952 = vsyncpa [#allocation4 + $0x1], 1 }
 0x415   :  { %2953 = vsyncpa [#allocation8], 1 }
 0x416   :  { %2955 = vsyncpa [#allocation8 + $0x1], 1 }
 0x417   :  { %2956 = vsyncpa [#allocation11], 1 }
 0x418   :  { %2958 = vsyncpa [#allocation11 + $0x1], 1 }
 0x419   :  { %2959 = vsyncpa [#allocation5], 1 }
 0x41a   :  { %2961 = vsyncpa [#allocation5 + $0x1], 1 }

</bundles_post_ra>
